<compile_context>
chip_gen: v7x
topology: tpu7x:2x2x1
jax: 0.10.0
libtpu: 0.0.40
codegen_flags: <defaults>
</compile_context>

<pallas_src>
import math

import jax
import jax.numpy as jnp
from jax import lax
from jax.experimental import pallas as pl
from jax.experimental.pallas import tpu as pltpu

IN, H1, H2, OUT = 16, 128, 2048, 7
OUT_PAD = 128  # lane-dense output width; columns 7..127 are exact zeros

# Row layout of the packed f32 parameter slab, shape (SLAB_ROWS, H2):
#   rows 0:16 -> w1 (16, 128)  in cols 0:128   (tile-aligned slice)
#   row  16   -> b1 (128,)     in cols 0:128
#   row  17   -> b3 (7,)       in cols 0:7 (zero-padded to 128)
#   row  18   -> b2 (2048,)
#   rows 19:24 -> zero padding (keeps the slab (8,128)-tile aligned)
_R_W1, _R_B1, _R_B3, _R_B2 = 0, 16, 17, 18
SLAB_ROWS = 24


def _mlp_kernel(x_ref, slab_ref, w2_ref, w3_ref, o_ref):
    # Static slices of the resident f32 parameter slab.
    w1 = slab_ref[_R_W1:_R_W1 + IN, 0:H1]        # (16, 128)
    b1 = slab_ref[_R_B1:_R_B1 + 1, 0:H1]         # (1, 128)
    b3 = slab_ref[_R_B3:_R_B3 + 1, 0:OUT_PAD]    # (1, 128) zero past col 7
    b2 = slab_ref[_R_B2:_R_B2 + 1, :]            # (1, 2048)

    # Layer 1: Linear(16 -> 128) + ReLU, f32 (w1 carries the *50 scale).
    h1 = jnp.dot(x_ref[...], w1, preferred_element_type=jnp.float32)
    h1 = jnp.maximum(h1 + b1, 0.0)

    # Layer 2: Linear(128 -> 2048) + ReLU.  bf16 MXU inputs, f32 accumulation;
    # bias add / ReLU kept in f32 (v5e has no bf16 VPU).
    h2 = jnp.dot(h1.astype(jnp.bfloat16), w2_ref[...],
                 preferred_element_type=jnp.float32)
    h2 = jnp.maximum(h2 + b2, 0.0)

    # Layer 3: Linear(2048 -> 7) + tanh against the 128-wide zero-padded bf16
    # weight, so the result/store is a full lane-dense (tm, 128) block:
    # unmasked vst + contiguous writeback DMA instead of 28 B/row masked stores.
    o = jnp.dot(h2.astype(jnp.bfloat16), w3_ref[...],
                preferred_element_type=jnp.float32)
    o_ref[...] = jnp.tanh(o + b3)                # tanh -> EUP; cols 7.. stay 0


def _round_up(n, m):
    return ((n + m - 1) // m) * m


def _hw_config():
    """(max_batch_tile, vmem_limit_bytes) chosen per TPU generation."""
    try:
        kind = jax.devices()[0].device_kind.lower()
    except Exception:
        kind = ""
    if "v5" in kind or "v6" in kind:
        # v5e/v5p/v6e: 128 MiB physical VMEM (default scoped 16/32 MiB).
        # v6e could push tm to 4096 (~2x bigger limit) for very large batches.
        return 2048, 96 << 20
    if "7" in kind:
        # v7x: only 64 MiB physical VMEM -> smaller tile, modest limit.
        return 1024, 48 << 20
    # Unknown / older generation: stay well inside the default scoped VMEM.
    return 256, None


def _choose_tiling(batch, max_tile):
    """Pick (tm, padded_batch) with tm % 8 == 0 and padded % tm == 0.

    Padding is bounded by ~8 rows per grid step (never "round the batch up to
    a whole tile").  Forces >= 2 grid steps once there are >= 16 rows so the
    "parallel" batch axis can shard across v7x's two TensorCores; on 1-TC
    chips the extra step costs ~0.35 us, negligible.
    """
    padded8 = _round_up(max(batch, 1), 8)
    steps = max(pl.cdiv(padded8, max_tile), 2 if padded8 >= 16 else 1)
    tm = _round_up(pl.cdiv(padded8, steps), 8)
    return tm, tm * steps


def testnet_forward(x, packed, *, max_batch_tile=None, vmem_limit_bytes=None):
    """x: (batch, 16) f32.  packed: (slab, w2_bf16, w3pad_bf16) from pack_params."""
    slab, w2, w3p = packed
    batch = x.shape[0]

    auto_tile, auto_vmem = _hw_config()
    if max_batch_tile is None:
        max_batch_tile = auto_tile
    if vmem_limit_bytes is None:
        vmem_limit_bytes = auto_vmem

    tm, padded = _choose_tiling(batch, max_batch_tile)
    if padded != batch:
        # Only a handful of rows (<= ~8 per grid step); not a whole-tile blowup.
        x = jnp.pad(x, ((0, padded - batch), (0, 0)))
    grid = (padded // tm,)

    flops = 2 * padded * (IN * H1 + H1 * H2 + H2 * OUT_PAD)
    bytes_accessed = (x.size * x.dtype.itemsize
                      + slab.size * slab.dtype.itemsize
                      + w2.size * w2.dtype.itemsize
                      + w3p.size * w3p.dtype.itemsize
                      + padded * OUT_PAD * 4)

    out = pl.pallas_call(
        _mlp_kernel,
        out_shape=jax.ShapeDtypeStruct((padded, OUT_PAD), jnp.float32),
        grid_spec=pltpu.PrefetchScalarGridSpec(
            num_scalar_prefetch=0,
            grid=grid,
            in_specs=[
                pl.BlockSpec((tm, IN), lambda i: (i, 0)),          # x: batch-tiled
                pl.BlockSpec((SLAB_ROWS, H2), lambda i: (0, 0)),   # slab: resident
                pl.BlockSpec((H1, H2), lambda i: (0, 0)),          # w2: resident
                pl.BlockSpec((H2, OUT_PAD), lambda i: (0, 0)),     # w3pad: resident
            ],
            out_specs=pl.BlockSpec((tm, OUT_PAD), lambda i: (i, 0)),
        ),
        compiler_params=pltpu.CompilerParams(
            dimension_semantics=("parallel",),   # shards across v7x's 2 TCs
            vmem_limit_bytes=vmem_limit_bytes,
        ),
        cost_estimate=pl.CostEstimate(
            flops=flops,
            transcendentals=padded * OUT_PAD,
            bytes_accessed=bytes_accessed,
        ),
    )(x, slab, w2, w3p)

    # Padded rows carry dummy (bias-only) values and cols 7..127 are zeros:
    # both MUST be sliced off here (keep this slice if the call site changes).
    return out[:batch, :OUT]


def _init_linear(key, fan_in, fan_out, weight_scale=1.0):
    """Mimic torch.nn.Linear default init: U(-1/sqrt(fan_in), 1/sqrt(fan_in))."""
    kw, kb = jax.random.split(key)
    bound = 1.0 / math.sqrt(fan_in)
    w = jax.random.uniform(kw, (fan_in, fan_out), jnp.float32, -bound, bound)
    w = w * weight_scale
    b = jax.random.uniform(kb, (fan_out,), jnp.float32, -bound, bound)
    return w, b


def init_params(key):
    k1, k2, k3 = jax.random.split(key, 3)
    w1, b1 = _init_linear(k1, IN, H1, weight_scale=50.0)   # inputLayer.weight *= 50.0
    w2, b2 = _init_linear(k2, H1, H2, weight_scale=0.1)    # hiddenLayer.weight *= 0.1
    w3, b3 = _init_linear(k3, H2, OUT, weight_scale=1.0)   # outputLayer
    return (w1, b1, w2, b2, w3, b3)


def pack_params(params):
    """Pack small params into one f32 slab; w2 + zero-padded w3 as bf16."""
    w1, b1, w2, b2, w3, b3 = params
    slab = jnp.zeros((SLAB_ROWS, H2), jnp.float32)
    slab = slab.at[_R_W1:_R_W1 + IN, 0:H1].set(w1)
    slab = slab.at[_R_B1, 0:H1].set(b1)
    slab = slab.at[_R_B3, 0:OUT].set(b3)
    slab = slab.at[_R_B2, :].set(b2)
    w3p = jnp.zeros((H2, OUT_PAD), jnp.float32).at[:, 0:OUT].set(w3)
    return slab, w2.astype(jnp.bfloat16), w3p.astype(jnp.bfloat16)


def reference_forward(x, packed):
    """Plain-JAX reference mirroring the kernel math (same bf16 weight path)."""
    slab, w2, w3p = packed
    w1 = slab[_R_W1:_R_W1 + IN, 0:H1]
    b1 = slab[_R_B1:_R_B1 + 1, 0:H1]
    b3 = slab[_R_B3:_R_B3 + 1, 0:OUT_PAD]
    b2 = slab[_R_B2:_R_B2 + 1, :]
    h1 = jnp.maximum(jnp.dot(x, w1, preferred_element_type=jnp.float32) + b1, 0.0)
    h2 = jnp.dot(h1.astype(jnp.bfloat16), w2, preferred_element_type=jnp.float32)
    h2 = jnp.maximum(h2 + b2, 0.0)
    o = jnp.dot(h2.astype(jnp.bfloat16), w3p, preferred_element_type=jnp.float32)
    return jnp.tanh(o + b3)[:, :OUT]


def reference_forward_f32(x, params):
    """True f32 forward of the PyTorch module (fidelity check only)."""
    w1, b1, w2, b2, w3, b3 = params
    hp = lax.Precision.HIGHEST
    h1 = jnp.maximum(jnp.dot(x, w1, precision=hp) + b1, 0.0)
    h2 = jnp.maximum(jnp.dot(h1, w2, precision=hp) + b2, 0.0)
    return jnp.tanh(jnp.dot(h2, w3, precision=hp) + b3)


if __name__ == "__main__":
    key = jax.random.PRNGKey(0)
    kp, kx = jax.random.split(key)

    params = init_params(kp)
    packed = pack_params(params)

    batch = 8
    x = jax.random.normal(kx, (batch, IN), dtype=jnp.float32)

    out = jax.block_until_ready(testnet_forward(x, packed))
    assert out.shape == (batch, OUT)

    # Matched-math reference (same bf16 weight path as the kernel).
    ref = reference_forward(x, packed)
    err = float(jnp.max(jnp.abs(out - ref)))
    assert jnp.allclose(out, ref, atol=3e-3, rtol=3e-3), err

    # Fidelity vs the pure-f32 PyTorch forward: bf16 w2/w3 introduce ~1e-2
    # level differences (intentional; halves the dominant HBM traffic).
    ref32 = reference_forward_f32(x, params)
    err32 = float(jnp.max(jnp.abs(out - ref32)))
    assert err32 < 0.1, err32

    print("KERNEL_OK")
</pallas_src>

<mosaic_0001>
module attributes {stable_mosaic.version = 11 : i64} {
  func.func @_mlp_kernel(%arg0: i32, %arg1: memref<8x16xf32, #tpu.memory_space<vmem>>, %arg2: memref<24x2048xf32, #tpu.memory_space<vmem>>, %arg3: memref<128x2048xbf16, #tpu.memory_space<vmem>>, %arg4: memref<2048x128xbf16, #tpu.memory_space<vmem>>, %arg5: memref<8x128xf32, #tpu.memory_space<vmem>>) attributes {dimension_semantics = [#tpu.dimension_semantics<parallel>], iteration_bounds = array<i64: 1>, scalar_prefetch = 0 : i64, scratch_operands = 0 : i64, tpu.core_type = #tpu.core_type<tc>, window_params = [{transform_indices = @transform_0, window_bounds = array<i64: 8, 16>}, {pipeline_mode = #tpu.pipeline_mode<synchronous>, transform_indices = @transform_1, window_bounds = array<i64: 24, 2048>}, {pipeline_mode = #tpu.pipeline_mode<synchronous>, transform_indices = @transform_2, window_bounds = array<i64: 128, 2048>}, {pipeline_mode = #tpu.pipeline_mode<synchronous>, transform_indices = @transform_3, window_bounds = array<i64: 2048, 128>}, {transform_indices = @transform_4, window_bounds = array<i64: 8, 128>}]} {
    %c0 = arith.constant 0 : index
    %c0_0 = arith.constant 0 : index
    %0 = vector.load %arg2[%c0, %c0_0] : memref<24x2048xf32, #tpu.memory_space<vmem>>, vector<16x128xf32>
    %c16 = arith.constant 16 : index
    %c0_1 = arith.constant 0 : index
    %1 = vector.load %arg2[%c16, %c0_1] : memref<24x2048xf32, #tpu.memory_space<vmem>>, vector<1x128xf32>
    %c17 = arith.constant 17 : index
    %c0_2 = arith.constant 0 : index
    %2 = vector.load %arg2[%c17, %c0_2] : memref<24x2048xf32, #tpu.memory_space<vmem>>, vector<1x128xf32>
    %c18 = arith.constant 18 : index
    %c0_3 = arith.constant 0 : index
    %3 = vector.load %arg2[%c18, %c0_3] : memref<24x2048xf32, #tpu.memory_space<vmem>>, vector<1x2048xf32>
    %c0_4 = arith.constant 0 : index
    %c0_5 = arith.constant 0 : index
    %4 = vector.load %arg1[%c0_4, %c0_5] : memref<8x16xf32, #tpu.memory_space<vmem>>, vector<8x16xf32>
    %cst = arith.constant dense<0.000000e+00> : vector<8x128xf32>
    %5 = tpu.matmul %4, %0, %cst {dimension_numbers = #tpu.dot_dimension_numbers<[1], [0], [0], [1], [0, 0, 1, 1], [], []>} : vector<8x16xf32>, vector<16x128xf32>, vector<8x128xf32> -> vector<8x128xf32>
    %6 = vector.broadcast %1 : vector<1x128xf32> to vector<8x128xf32>
    %7 = arith.addf %5, %6 : vector<8x128xf32>
    %cst_6 = arith.constant 0.000000e+00 : f32
    %8 = vector.broadcast %cst_6 : f32 to vector<8x128xf32>
    %9 = arith.maximumf %7, %8 : vector<8x128xf32>
    %10 = arith.truncf %9 : vector<8x128xf32> to vector<8x128xbf16>
    %c0_7 = arith.constant 0 : index
    %c0_8 = arith.constant 0 : index
    %11 = vector.load %arg3[%c0_7, %c0_8] : memref<128x2048xbf16, #tpu.memory_space<vmem>>, vector<128x2048xbf16>
    %cst_9 = arith.constant dense<0.000000e+00> : vector<8x2048xf32>
    %12 = tpu.matmul %10, %11, %cst_9 {dimension_numbers = #tpu.dot_dimension_numbers<[1], [0], [0], [1], [0, 0, 1, 1], [], []>} : vector<8x128xbf16>, vector<128x2048xbf16>, vector<8x2048xf32> -> vector<8x2048xf32>
    %13 = vector.broadcast %3 : vector<1x2048xf32> to vector<8x2048xf32>
    %14 = arith.addf %12, %13 : vector<8x2048xf32>
    %cst_10 = arith.constant 0.000000e+00 : f32
    %15 = vector.broadcast %cst_10 : f32 to vector<8x2048xf32>
    %16 = arith.maximumf %14, %15 : vector<8x2048xf32>
    %17 = arith.truncf %16 : vector<8x2048xf32> to vector<8x2048xbf16>
    %c0_11 = arith.constant 0 : index
    %c0_12 = arith.constant 0 : index
    %18 = vector.load %arg4[%c0_11, %c0_12] : memref<2048x128xbf16, #tpu.memory_space<vmem>>, vector<2048x128xbf16>
    %cst_13 = arith.constant dense<0.000000e+00> : vector<8x128xf32>
    %19 = tpu.matmul %17, %18, %cst_13 {dimension_numbers = #tpu.dot_dimension_numbers<[1], [0], [0], [1], [0, 0, 1, 1], [], []>} : vector<8x2048xbf16>, vector<2048x128xbf16>, vector<8x128xf32> -> vector<8x128xf32>
    %20 = vector.broadcast %2 : vector<1x128xf32> to vector<8x128xf32>
    %21 = arith.addf %19, %20 : vector<8x128xf32>
    %22 = math.tanh %21 : vector<8x128xf32>
    %c0_14 = arith.constant 0 : index
    %c0_15 = arith.constant 0 : index
    %23 = vector.load %arg5[%c0_14, %c0_15] : memref<8x128xf32, #tpu.memory_space<vmem>>, vector<8x128xf32>
    tpu.vector_store %arg5[%c0_14, %c0_15], %22 {strides = array<i32>} : memref<8x128xf32, #tpu.memory_space<vmem>>, vector<8x128xf32>,
    return
  }
  func.func @transform_0(%arg0: i32) -> (i32, i32) {
    %c0_i32 = arith.constant 0 : i32
    %c0_i32_0 = arith.constant 0 : i32
    return %arg0, %c0_i32 : i32, i32
  }
  func.func @transform_1(%arg0: i32) -> (i32, i32) {
    %c0_i32 = arith.constant 0 : i32
    %c0_i32_0 = arith.constant 0 : i32
    %c0_i32_1 = arith.constant 0 : i32
    return %c0_i32, %c0_i32_0 : i32, i32
  }
  func.func @transform_2(%arg0: i32) -> (i32, i32) {
    %c0_i32 = arith.constant 0 : i32
    %c0_i32_0 = arith.constant 0 : i32
    %c0_i32_1 = arith.constant 0 : i32
    return %c0_i32, %c0_i32_0 : i32, i32
  }
  func.func @transform_3(%arg0: i32) -> (i32, i32) {
    %c0_i32 = arith.constant 0 : i32
    %c0_i32_0 = arith.constant 0 : i32
    %c0_i32_1 = arith.constant 0 : i32
    return %c0_i32, %c0_i32_0 : i32, i32
  }
  func.func @transform_4(%arg0: i32) -> (i32, i32) {
    %c0_i32 = arith.constant 0 : i32
    %c0_i32_0 = arith.constant 0 : i32
    return %arg0, %c0_i32 : i32, i32
  }
}

</mosaic_0001>

<bundles_post_ra>
// kernel: tpu_custom_call.1
= control target key start
LH: loop header
LB: loop body
LE: loop exit
PB: predicated region body
PF: predicated region fallthrough
CT: control target
= control target key end

     0   :  { %9 = vsyncpa [#allocation3], 0  ;;  %s3621_s0 = inlined_call_operand.hbm [shape: f32[8,16], index: 0, kind: input, shape index: {}]   ;;  %s3622_s1 = inlined_call_operand.hbm [shape: f32[24,2048], index: 1, kind: input, shape index: {}]   ;;  %s3623_s2 = inlined_call_operand.hbm [shape: bf16[128,2048], index: 2, kind: input, shape index: {}]   ;;  %s3624_s3 = inlined_call_operand.hbm [shape: bf16[2048,128], index: 3, kind: input, shape index: {}]   ;;  %s3625_s4 = inlined_call_operand.hbm [shape: f32[8,128], index: 4, kind: output, shape index: {}]  }
   0x1   :  { %10 = vsyncpa [#allocation6], 0 }
   0x2   :  { %11 = vsyncpa [#allocation9], 0 }
   0x3   :  { %12 = vsyncpa [#allocation4], 0  ;;  %s3442_s15 = smov [#allocation5]   ;;  %s3324_s19 = scalar_lea.hbm %s3622_s1, 6144 }
   0x4   :  { %s28_s16 = sshll.u32 %s3442_s15, 4  ;;  %p3325_p0 = scmp.ne.s32.totalorder %s3622_s1, %s3324_s19  ;;  %s29_s16 = int_to_ptr.vmem [resolvable:$true] %s28_s16 }
   0x5   :  { %p3328_p1 = scmp.lt.u32.totalorder %s3324_s19, %s3622_s1 }
   0x7   :  { %p3330_p2 = pnand %p3328_p1, %p3325_p0 }
   0x9   :  { %3333 = shalt.err (!%p3330_p2)
}
   0xa   :  { %s3334_s24 = scalar_lea.vmem %s29_s16, 6144  ;;  %p3339_p4 = scmp.lt.s32.totalorder %s29_s16, %s29_s16 }
   0xb   :  { %p3335_p3 = scmp.ne.s32.totalorder %s29_s16, %s3334_s24  ;;  %p3340_p5 = scmp.lt.s32.totalorder %s3334_s24, %s3334_s24 }
   0xd   :  { %p3341_p6 = por %p3340_p5, %p3339_p4 }
   0xf   :  { %p3342_p7 = pnand %p3341_p6, %p3335_p3 }
  0x11   :  { %3345 = shalt.err (!%p3342_p7)
}
  0x12   :  { %s3443_s25 = smov 2048   ;;  %s3444_s26 = smov 128  }
  0x13   :  { %34 = dma.hbm_to_vmem [thread:$0]  %s3622_s1, 6144, %s29_s16, [#allocation6], %s3443_s25, %s3443_s25, %s3444_s26  }
  0x14   :  { %s3445_s29 = smov [#allocation2]   ;;  %s3446_s5 = smov [#allocation7]  }
  0x15   :  { %s19_s30 = sshll.u32 %s3445_s29, 4  ;;  %s40_s6 = sshll.u32 %s3446_s5, 4  ;;  %s20_s30 = int_to_ptr.vmem [resolvable:$true] %s19_s30  ;;  %s41_s6 = int_to_ptr.vmem [resolvable:$true] %s40_s6 }
  0x16   :  { %s3346_s9 = scalar_lea.hbm %s3621_s0, 128 }
  0x17   :  { %p3347_p8 = scmp.ne.s32.totalorder %s3621_s0, %s3346_s9  ;;  %p3350_p9 = scmp.lt.u32.totalorder %s3346_s9, %s3621_s0 }
  0x19   :  { %p3352_p10 = pnand %p3350_p9, %p3347_p8 }
  0x1b   :  { %3355 = shalt.err (!%p3352_p10)
}
  0x1c   :  { %s3356_s1 = scalar_lea.vmem %s20_s30, 128  ;;  %p3361_p12 = scmp.lt.s32.totalorder %s20_s30, %s20_s30 }
  0x1d   :  { %p3357_p11 = scmp.ne.s32.totalorder %s20_s30, %s3356_s1  ;;  %p3362_p13 = scmp.lt.s32.totalorder %s3356_s1, %s3356_s1 }
  0x1f   :  { %p3363_p0 = por %p3362_p13, %p3361_p12 }
  0x21   :  { %p3364_p1 = pnand %p3363_p0, %p3357_p11 }
  0x23   :  { %3367 = shalt.err (!%p3364_p1)
}
  0x24   :  { %22 = dma.hbm_to_vmem [thread:$0]  %s3621_s0, 128, %s20_s30, [#allocation3]  }
  0x25   :  { %s3368_s18 = scalar_lea.hbm %s3623_s2, 16384 }
  0x26   :  { %p3369_p2 = scmp.ne.s32.totalorder %s3623_s2, %s3368_s18  ;;  %p3372_p3 = scmp.lt.u32.totalorder %s3368_s18, %s3623_s2 }
  0x28   :  { %p3374_p4 = pnand %p3372_p3, %p3369_p2 }
  0x2a   :  { %3377 = shalt.err (!%p3374_p4)
}
  0x2b   :  { %s3378_s23 = scalar_lea.vmem %s41_s6, 16384  ;;  %p3383_p6 = scmp.lt.s32.totalorder %s41_s6, %s41_s6 }
  0x2c   :  { %p3379_p5 = scmp.ne.s32.totalorder %s41_s6, %s3378_s23  ;;  %p3384_p7 = scmp.lt.s32.totalorder %s3378_s23, %s3378_s23 }
  0x2e   :  { %p3385_p8 = por %p3384_p7, %p3383_p6 }
  0x30   :  { %p3386_p9 = pnand %p3385_p8, %p3379_p5 }
  0x32   :  { %3389 = shalt.err (!%p3386_p9)
}
  0x33   :  { %s3447_s0 = smov 1024   ;;  %s3448_s24 = smov 64  }
  0x34   :  { %46 = dma.hbm_to_vmem [thread:$0]  %s3623_s2, 16384, %s41_s6, [#allocation6], %s3447_s0, %s3447_s0, %s3448_s24  }
  0x35   :  { %s3449_s27 = smov [#allocation8]   ;;  %s3390_s5 = scalar_lea.hbm %s3624_s3, 16384 }
  0x36   :  { %s52_s28 = sshll.u32 %s3449_s27, 4  ;;  %p3391_p10 = scmp.ne.s32.totalorder %s3624_s3, %s3390_s5  ;;  %s53_s28 = int_to_ptr.vmem [resolvable:$true] %s52_s28 }
  0x37   :  { %p3394_p11 = scmp.lt.u32.totalorder %s3390_s5, %s3624_s3 }
  0x39   :  { %p3396_p12 = pnand %p3394_p11, %p3391_p10 }
  0x3b   :  { %3399 = shalt.err (!%p3396_p12)
}
  0x3c   :  { %s3400_s11 = scalar_lea.vmem %s53_s28, 16384  ;;  %p3405_p0 = scmp.lt.s32.totalorder %s53_s28, %s53_s28 }
  0x3d   :  { %p3401_p13 = scmp.ne.s32.totalorder %s53_s28, %s3400_s11  ;;  %p3406_p1 = scmp.lt.s32.totalorder %s3400_s11, %s3400_s11 }
  0x3f   :  { %p3407_p2 = por %p3406_p1, %p3405_p0 }
  0x41   :  { %p3408_p3 = pnand %p3407_p2, %p3401_p13 }
  0x43   :  { %3411 = shalt.err (!%p3408_p3)
}
  0x44   :  { %s3450_s2 = smov 4  }
  0x45   :  { %58 = dma.hbm_to_vmem [thread:$0]  %s3624_s3, 16384, %s53_s28, [#allocation9], %s3448_s24, %s3448_s24, %s3450_s2  }
  0x46   :  { %3434 = dma.done.wait [#allocation3], 128  }
  0x47   :  { %3435 = vsyncadd [#allocation3], 4294967168 }
  0x48   :  { %3436 = dma.done.wait [#allocation6], 22528  }
  0x49   :  { %3437 = vsyncadd [#allocation6], 4294944768 }
  0x4a   :  { %3438 = dma.done.wait [#allocation9], 16384  }
  0x4b   :  { %3439 = vsyncadd [#allocation9], 4294950912  ;;  %v3451_v0 = vmov 0.0|0.0   ;;  %vm3452_vm0 = vmmov 0   ;;  %v3453_v1 = vmov 0.0   ;;  %v72_v2 = vld [vmem:[#allocation5] sm:$0xff] }
  0x4c   :  { %3177 = vmatprep.subr.bf16.mxu0 %v3451_v0  ;;  %3174 = vmatprep.mubr.msk.f32.mxu0 %vm3452_vm0, %v3453_v1  ;;  %v73_v3 = vld [vmem:[#allocation5 + $0x80] sm:$0xff]  ;;  %v84_v5 = vld [vmem:[#allocation2] sm:$0xff]  ;;  %v162_v8 = vld [vmem:[#allocation7 + $0x8] sm:$0xff]  ;;  %vm85_vm1 = vcmask 130048   ;;  %s3455_s3 = smov [#allocation10]  }
  0x4d   :  { %v3178_v4 = vpack.c.bf16 %v73_v3, %v72_v2  ;;  %v161_v6 = vld [vmem:[#allocation7] sm:$0xff]  ;;  %v170_v10 = vld [vmem:[#allocation7 + $0x48] sm:$0xff]  ;;  %s2723_s13 = sshll.u32 %s3455_s3, 4  ;;  %s2724_s13 = int_to_ptr.vmem [resolvable:$true] %s2723_s13 }
  0x4e   :  { %v169_v7 = vld [vmem:[#allocation7 + $0x40] sm:$0xff]  ;;  %v2737_v14 = vcombine.low %v162_v8, %v170_v10  ;;  %v2738_v15 = vcombine.high %v162_v8, %v170_v10  ;;  %v178_v17 = vld [vmem:[#allocation7 + $0x88] sm:$0xff]  ;;  %v164_v8 = vld [vmem:[#allocation7 + $0x18] sm:$0xff]  ;;  %s3412_s1 = scalar_lea.vmem %s2724_s13, 128  ;;  %p3417_p5 = scmp.lt.s32.totalorder %s2724_s13, %s2724_s13 }
  0x4f   :  { %v2736_v9 = vcombine.high %v161_v6, %v169_v7  ;;  %v2735_v11 = vcombine.low %v161_v6, %v169_v7  ;;  %v177_v12 = vld [vmem:[#allocation7 + $0x80] sm:$0xff]  ;;  %3179 = vmatpush3.bf16.msra.mxu0 %v3178_v4  ;;  %v186_v18 = vld [vmem:[#allocation7 + $0xc8] sm:$0xff]  ;;  %v163_v6 = vld [vmem:[#allocation7 + $0x10] sm:$0xff]  ;;  %p3413_p4 = scmp.ne.s32.totalorder %s2724_s13, %s3412_s1  ;;  %p3418_p6 = scmp.lt.s32.totalorder %s3412_s1, %s3412_s1 }
  0x50   :  { %v185_v13 = vld [vmem:[#allocation7 + $0xc0] sm:$0xff]  ;;  %v2754_v20 = vcombine.high %v178_v17, %v186_v18  ;;  %1052 = vmatprep.subr.bf16.mxu0 %v2738_v15  ;;  %v194_v23 = vld [vmem:[#allocation7 + $0x108] sm:$0xff]  ;;  %v2753_v26 = vcombine.low %v178_v17, %v186_v18  ;;  %v171_v7 = vld [vmem:[#allocation7 + $0x50] sm:$0xff] }
  0x51   :  { %v2752_v16 = vcombine.high %v177_v12, %v185_v13  ;;  %v193_v19 = vld [vmem:[#allocation7 + $0x100] sm:$0xff]  ;;  %1011 = vmatprep.subr.bf16.mxu1 %v2736_v9  ;;  %v2751_v22 = vcombine.low %v177_v12, %v185_v13  ;;  %v202_v24 = vld [vmem:[#allocation7 + $0x148] sm:$0xff]  ;;  %v2740_v9 = vcombine.high %v163_v6, %v171_v7  ;;  %v172_v10 = vld [vmem:[#allocation7 + $0x58] sm:$0xff]  ;;  %p3419_p7 = por %p3418_p6, %p3417_p5 }
  0x52   :  { %v201_v21 = vld [vmem:[#allocation7 + $0x140] sm:$0xff]  ;;  %1012 = vmatpush1.bf16.msra.mxu1 %v2735_v11  ;;  %3175 = vmatmul.mubr.msk.f32.vlgmr.msra.gmra.mrb[0].mxu0 %vm85_vm1, %v84_v5  ;;  %v2770_v29 = vcombine.high %v194_v23, %v202_v24  ;;  %v210_v31 = vld [vmem:[#allocation7 + $0x188] sm:$0xff]  ;;  %v2769_v36 = vcombine.low %v194_v23, %v202_v24  ;;  %v2739_v11 = vcombine.low %v163_v6, %v171_v7  ;;  %v284_v6 = vld [vmem:[#allocation7 + $0x3d8] sm:$0xff] }
  0x53   :  { %1013 = vmatprep.subr.bf16.mxu1 %v2752_v16  ;;  %v2768_v25 = vcombine.high %v193_v19, %v201_v21  ;;  %1053 = vmatpush1.bf16.msra.mxu0 %v2737_v14  ;;  %v209_v27 = vld [vmem:[#allocation7 + $0x180] sm:$0xff]  ;;  %v2767_v30 = vcombine.low %v193_v19, %v201_v21  ;;  %v218_v32 = vld [vmem:[#allocation7 + $0x1c8] sm:$0xff]  ;;  %v2741_v12 = vcombine.low %v164_v8, %v172_v10  ;;  %v3454_v14 = vmov 0   ;;  %v179_v19 = vld [vmem:[#allocation7 + $0x90] sm:$0xff]  ;;  %p3420_p8 = pnand %p3419_p7, %p3413_p4 }
  0x54   :  { %v217_v28 = vld [vmem:[#allocation7 + $0x1c0] sm:$0xff]  ;;  %1054 = vmatprep.subr.bf16.mxu0 %v2754_v20  ;;  %v226_v37 = vld [vmem:[#allocation7 + $0x208] sm:$0xff]  ;;  %v2786_v39 = vcombine.high %v210_v31, %v218_v32  ;;  %v2785_v44 = vcombine.low %v210_v31, %v218_v32  ;;  %v2742_v13 = vcombine.high %v164_v8, %v172_v10  ;;  %1043 = vmatprep.mubr.bf16.mxu1 %v3454_v14  ;;  %v187_v20 = vld [vmem:[#allocation7 + $0xd0] sm:$0xff] }
  0x55   :  { %v2784_v33 = vcombine.high %v209_v27, %v217_v28  ;;  %v225_v34 = vld [vmem:[#allocation7 + $0x200] sm:$0xff]  ;;  %v234_v38 = vld [vmem:[#allocation7 + $0x248] sm:$0xff]  ;;  %v2783_v40 = vcombine.low %v209_v27, %v217_v28  ;;  %1084 = vmatprep.mubr.bf16.mxu0 %v3454_v14  ;;  %v180_v21 = vld [vmem:[#allocation7 + $0x98] sm:$0xff]  ;;  %v2755_v31 = vcombine.low %v179_v19, %v187_v20 }
  0x56   :  { %1014 = vmatpush1.bf16.msra.mxu1 %v2751_v22  ;;  %v233_v35 = vld [vmem:[#allocation7 + $0x240] sm:$0xff]  ;;  %v242_v45 = vld [vmem:[#allocation7 + $0x288] sm:$0xff]  ;;  %v2802_v47 = vcombine.high %v226_v37, %v234_v38  ;;  %v2801_v52 = vcombine.low %v226_v37, %v234_v38  ;;  %v188_v22 = vld [vmem:[#allocation7 + $0xd8] sm:$0xff] }
  0x57   :  { %1015 = vmatprep.subr.bf16.mxu1 %v2768_v25  ;;  %1055 = vmatpush1.bf16.msra.mxu0 %v2753_v26  ;;  %v241_v41 = vld [vmem:[#allocation7 + $0x280] sm:$0xff]  ;;  %v2800_v43 = vcombine.high %v225_v34, %v233_v35  ;;  %v250_v46 = vld [vmem:[#allocation7 + $0x2c8] sm:$0xff]  ;;  %v2799_v48 = vcombine.low %v225_v34, %v233_v35  ;;  %v2756_v25 = vcombine.high %v179_v19, %v187_v20  ;;  %v195_v27 = vld [vmem:[#allocation7 + $0x110] sm:$0xff] }
  0x58   :  { %1056 = vmatprep.subr.bf16.mxu0 %v2770_v29  ;;  %v249_v42 = vld [vmem:[#allocation7 + $0x2c0] sm:$0xff]  ;;  %v258_v53 = vld [vmem:[#allocation7 + $0x308] sm:$0xff]  ;;  %v2818_v55 = vcombine.high %v242_v45, %v250_v46  ;;  %v2817_v58 = vcombine.low %v242_v45, %v250_v46  ;;  %v2758_v26 = vcombine.high %v180_v21, %v188_v22  ;;  %v203_v28 = vld [vmem:[#allocation7 + $0x150] sm:$0xff]  ;;  %v2757_v32 = vcombine.low %v180_v21, %v188_v22 }
  0x59   :  { %v257_v49 = vld [vmem:[#allocation7 + $0x300] sm:$0xff]  ;;  %v2816_v51 = vcombine.high %v241_v41, %v249_v42  ;;  %v266_v54 = vld [vmem:[#allocation7 + $0x348] sm:$0xff]  ;;  %v2815_v56 = vcombine.low %v241_v41, %v249_v42  ;;  %v196_v29 = vld [vmem:[#allocation7 + $0x118] sm:$0xff] }
  0x5a   :  { %1016 = vmatpush1.bf16.msra.mxu1 %v2767_v30  ;;  %v265_v50 = vld [vmem:[#allocation7 + $0x340] sm:$0xff]  ;;  %v2834_v59 = vcombine.high %v258_v53, %v266_v54  ;;  %v2833_v61 = vcombine.low %v258_v53, %v266_v54  ;;  %v274_v0 = vld [vmem:[#allocation7 + $0x388] sm:$0xff]  ;;  %v204_v30 = vld [vmem:[#allocation7 + $0x158] sm:$0xff] }
  0x5b   :  { %1017 = vmatprep.subr.bf16.mxu1 %v2784_v33  ;;  %1057 = vmatpush1.bf16.msra.mxu0 %v2769_v36  ;;  %v2832_v57 = vcombine.high %v257_v49, %v265_v50  ;;  %v2831_v60 = vcombine.low %v257_v49, %v265_v50  ;;  %v273_v62 = vld [vmem:[#allocation7 + $0x380] sm:$0xff]  ;;  %v282_v2 = vld [vmem:[#allocation7 + $0x3c8] sm:$0xff]  ;;  %v2772_v33 = vcombine.high %v195_v27, %v203_v28  ;;  %v211_v35 = vld [vmem:[#allocation7 + $0x190] sm:$0xff] }
  0x5c   :  { %1058 = vmatprep.subr.bf16.mxu0 %v2786_v39  ;;  %v281_v63 = vld [vmem:[#allocation7 + $0x3c0] sm:$0xff]  ;;  %v2849_v3 = vcombine.low %v274_v0, %v282_v2  ;;  %v2850_v4 = vcombine.high %v274_v0, %v282_v2  ;;  %v2774_v34 = vcombine.high %v196_v29, %v204_v30  ;;  %v219_v36 = vld [vmem:[#allocation7 + $0x1d0] sm:$0xff]  ;;  %v212_v37 = vld [vmem:[#allocation7 + $0x198] sm:$0xff]  ;;  %v2771_v39 = vcombine.low %v195_v27, %v203_v28 }
  0x5d   :  { %v2848_v1 = vcombine.high %v273_v62, %v281_v63  ;;  %v2847_v5 = vcombine.low %v273_v62, %v281_v63  ;;  %v74_v15 = vld [vmem:[#allocation5 + $0x100] ss:$0 sm:$0xff]  ;;  %v220_v38 = vld [vmem:[#allocation7 + $0x1d8] sm:$0xff]  ;;  %v2788_v41 = vcombine.high %v211_v35, %v219_v36  ;;  %v182_v22 = vld [vmem:[#allocation7 + $0xa8] sm:$0xff] }
  0x5e   :  { %1018 = vmatpush1.bf16.msra.mxu1 %v2783_v40  ;;  %v2773_v40 = vcombine.low %v196_v29, %v204_v30  ;;  %v2790_v42 = vcombine.high %v212_v37, %v220_v38  ;;  %v228_v45 = vld [vmem:[#allocation7 + $0x218] sm:$0xff]  ;;  %v181_v20 = vld [vmem:[#allocation7 + $0xa0] sm:$0xff] }
  0x5f   :  { %1019 = vmatprep.subr.bf16.mxu1 %v2800_v43  ;;  %1059 = vmatpush1.bf16.msra.mxu0 %v2785_v44  ;;  %v227_v43 = vld [vmem:[#allocation7 + $0x210] sm:$0xff]  ;;  %v236_v46 = vld [vmem:[#allocation7 + $0x258] sm:$0xff]  ;;  %v189_v21 = vld [vmem:[#allocation7 + $0xe0] sm:$0xff] }
  0x60   :  { %1060 = vmatprep.subr.bf16.mxu0 %v2802_v47  ;;  %v235_v44 = vld [vmem:[#allocation7 + $0x250] sm:$0xff]  ;;  %v2787_v47 = vcombine.low %v211_v35, %v219_v36  ;;  %v2806_v50 = vcombine.high %v228_v45, %v236_v46  ;;  %v244_v53 = vld [vmem:[#allocation7 + $0x298] sm:$0xff]  ;;  %v2760_v27 = vcombine.high %v181_v20, %v189_v21  ;;  %v197_v29 = vld [vmem:[#allocation7 + $0x120] sm:$0xff] }
  0x61   :  { %v2804_v49 = vcombine.high %v227_v43, %v235_v44  ;;  %v252_v54 = vld [vmem:[#allocation7 + $0x2d8] sm:$0xff]  ;;  %v205_v30 = vld [vmem:[#allocation7 + $0x160] sm:$0xff] }
  0x62   :  { %1020 = vmatpush1.bf16.msra.mxu1 %v2799_v48  ;;  %v2789_v48 = vcombine.low %v212_v37, %v220_v38  ;;  %v268_v62 = vld [vmem:[#allocation7 + $0x358] sm:$0xff]  ;;  %v2821_v0 = vcombine.low %v244_v53, %v252_v54  ;;  %v2776_v35 = vcombine.high %v197_v29, %v205_v30  ;;  %v213_v37 = vld [vmem:[#allocation7 + $0x1a0] sm:$0xff] }
  0x63   :  { %1021 = vmatprep.subr.bf16.mxu1 %v2816_v51  ;;  %1061 = vmatpush1.bf16.msra.mxu0 %v2801_v52  ;;  %v243_v51 = vld [vmem:[#allocation7 + $0x290] sm:$0xff]  ;;  %v221_v38 = vld [vmem:[#allocation7 + $0x1e0] sm:$0xff] }
  0x64   :  { %1062 = vmatprep.subr.bf16.mxu0 %v2818_v55  ;;  %v251_v52 = vld [vmem:[#allocation7 + $0x2d0] sm:$0xff]  ;;  %v2803_v55 = vcombine.low %v227_v43, %v235_v44  ;;  %v2792_v43 = vcombine.high %v213_v37, %v221_v38 }
  0x65   :  { %v2819_v63 = vcombine.low %v243_v51, %v251_v52 }
  0x66   :  { %1022 = vmatpush1.bf16.msra.mxu1 %v2815_v56  ;;  %v2805_v56 = vcombine.low %v228_v45, %v236_v46  ;;  %v229_v45 = vld [vmem:[#allocation7 + $0x220] sm:$0xff] }
  0x67   :  { %1023 = vmatprep.subr.bf16.mxu1 %v2832_v57  ;;  %1063 = vmatpush1.bf16.msra.mxu0 %v2817_v58  ;;  %v2820_v57 = vcombine.high %v243_v51, %v251_v52  ;;  %v2822_v58 = vcombine.high %v244_v53, %v252_v54  ;;  %v237_v46 = vld [vmem:[#allocation7 + $0x260] sm:$0xff] }
  0x68   :  { %1064 = vmatprep.subr.bf16.mxu0 %v2834_v59  ;;  %v259_v59 = vld [vmem:[#allocation7 + $0x310] sm:$0xff]  ;;  %v2808_v51 = vcombine.high %v229_v45, %v237_v46  ;;  %v245_v53 = vld [vmem:[#allocation7 + $0x2a0] sm:$0xff] }
  0x69   :  { %v253_v54 = vld [vmem:[#allocation7 + $0x2e0] sm:$0xff] }
  0x6a   :  { %1024 = vmatpush1.bf16.msra.mxu1 %v2831_v60  ;;  %v267_v60 = vld [vmem:[#allocation7 + $0x350] sm:$0xff] }
  0x6b   :  { %1065 = vmatpush1.bf16.msra.mxu0 %v2833_v61  ;;  %1025 = vmatprep.subr.bf16.mxu1 %v2848_v1  ;;  %v260_v61 = vld [vmem:[#allocation7 + $0x318] sm:$0xff]  ;;  %v2836_v1 = vcombine.high %v259_v59, %v267_v60  ;;  %v2835_v7 = vcombine.low %v259_v59, %v267_v60  ;;  %v2824_v59 = vcombine.high %v245_v53, %v253_v54 }
  0x6c   :  { %1066 = vmatprep.subr.bf16.mxu0 %v2850_v4  ;;  %v2838_v2 = vcombine.high %v260_v61, %v268_v62  ;;  %v283_v4 = vld [vmem:[#allocation7 + $0x3d0] sm:$0xff]  ;;  %v2837_v8 = vcombine.low %v260_v61, %v268_v62  ;;  %v261_v61 = vld [vmem:[#allocation7 + $0x320] sm:$0xff] }
  0x6d   :  { %v269_v62 = vld [vmem:[#allocation7 + $0x360] sm:$0xff] }
  0x6e   :  { %1026 = vmatpush1.bf16.msra.mxu1 %v2847_v5  ;;  %v276_v5 = vld [vmem:[#allocation7 + $0x398] sm:$0xff] }
  0x6f   :  { %1067 = vmatpush1.bf16.msra.mxu0 %v2849_v3  ;;  %1093 = vmatprep.subr.bf16.mxu1 %v2740_v9  ;;  %v275_v3 = vld [vmem:[#allocation7 + $0x390] sm:$0xff]  ;;  %v2854_v10 = vcombine.high %v276_v5, %v284_v6 }
  0x70   :  { %1134 = vmatprep.subr.bf16.mxu0 %v2742_v13  ;;  %v2852_v9 = vcombine.high %v275_v3, %v283_v4  ;;  %v166_v13 = vld [vmem:[#allocation7 + $0x28] sm:$0xff] }
 0x125   :  { %v155_v16 = vpop.f32.mrb[0].mxu0 }
 0x126   :  { %v156_v17 = vadd.f32 %v155_v16, %v74_v15  ;;  %v3176_v18 = vpop.f32.mrb[1].mxu0  ;;  %v174_v15 = vld [vmem:[#allocation7 + $0x68] sm:$0xff]  ;;  %v2851_v16 = vcombine.low %v275_v3, %v283_v4  ;;  %v2840_v3 = vcombine.high %v261_v61, %v269_v62 }
 0x127   :  { %v2746_v19 = vcombine.high %v166_v13, %v174_v15 }
 0x128   :  { %v159_v23 = vmax.f32 %v156_v17, 0.0  ;;  %v2853_v17 = vcombine.low %v276_v5, %v284_v6  ;;  %v277_v5 = vld [vmem:[#allocation7 + $0x3a0] sm:$0xff] }
 0x129   :  { %v285_v6 = vld [vmem:[#allocation7 + $0x3e0] sm:$0xff] }
 0x12a   :  { %v3531_v24 = vpack.c.bf16 %v159_v23, %v159_v23  ;;  %v190_v23 = vld [vmem:[#allocation7 + $0xe8] sm:$0xff] }
 0x12b   :  { %v2762_v28 = vcombine.high %v182_v22, %v190_v23 }
 0x12c   :  { %1044 = vmatmul.mubr.bf16.vlgmr.msra.gmra.mrb[0].mxu1 %v3531_v24  ;;  %1085 = vmatmul.mubr.bf16.vlgmr.msra.gmra.mrb[4].mxu0 %v3531_v24 }
 0x12d   :  { %1094 = vmatpush1.bf16.msra.mxu1 %v2739_v11  ;;  %1135 = vmatpush1.bf16.msra.mxu0 %v2741_v12  ;;  %v165_v11 = vld [vmem:[#allocation7 + $0x20] sm:$0xff] }
 0x12e   :  { %1095 = vmatprep.subr.bf16.mxu1 %v2756_v25  ;;  %1136 = vmatprep.subr.bf16.mxu0 %v2758_v26  ;;  %v173_v12 = vld [vmem:[#allocation7 + $0x60] sm:$0xff]  ;;  %v2745_v26 = vcombine.low %v166_v13, %v174_v15  ;;  %v167_v13 = vld [vmem:[#allocation7 + $0x30] sm:$0xff] }
 0x12f   :  { %1125 = vmatprep.mubr.bf16.mxu1 %v3454_v14  ;;  %1166 = vmatprep.mubr.bf16.mxu0 %v3454_v14  ;;  %v2744_v18 = vcombine.high %v165_v11, %v173_v12  ;;  %v2743_v25 = vcombine.low %v165_v11, %v173_v12  ;;  %v2856_v11 = vcombine.high %v277_v5, %v285_v6  ;;  %v175_v15 = vld [vmem:[#allocation7 + $0x70] sm:$0xff] }
 0x131   :  { %1096 = vmatpush1.bf16.msra.mxu1 %v2755_v31  ;;  %1137 = vmatpush1.bf16.msra.mxu0 %v2757_v32  ;;  %v198_v31 = vld [vmem:[#allocation7 + $0x128] sm:$0xff] }
 0x132   :  { %1097 = vmatprep.subr.bf16.mxu1 %v2772_v33  ;;  %1138 = vmatprep.subr.bf16.mxu0 %v2774_v34  ;;  %v206_v32 = vld [vmem:[#allocation7 + $0x168] sm:$0xff]  ;;  %v2759_v33 = vcombine.low %v181_v20, %v189_v21  ;;  %v2761_v34 = vcombine.low %v182_v22, %v190_v23  ;;  %v2748_v20 = vcombine.high %v167_v13, %v175_v15  ;;  %v183_v22 = vld [vmem:[#allocation7 + $0xb0] sm:$0xff] }
 0x133   :  { %v2778_v36 = vcombine.high %v198_v31, %v206_v32  ;;  %v191_v23 = vld [vmem:[#allocation7 + $0xf0] sm:$0xff] }
 0x135   :  { %1098 = vmatpush1.bf16.msra.mxu1 %v2771_v39  ;;  %1139 = vmatpush1.bf16.msra.mxu0 %v2773_v40  ;;  %v214_v39 = vld [vmem:[#allocation7 + $0x1a8] sm:$0xff] }
 0x136   :  { %1099 = vmatprep.subr.bf16.mxu1 %v2788_v41  ;;  %1140 = vmatprep.subr.bf16.mxu0 %v2790_v42  ;;  %v222_v40 = vld [vmem:[#allocation7 + $0x1e8] sm:$0xff]  ;;  %v2775_v41 = vcombine.low %v197_v29, %v205_v30  ;;  %v2777_v42 = vcombine.low %v198_v31, %v206_v32  ;;  %v2764_v29 = vcombine.high %v183_v22, %v191_v23  ;;  %v199_v31 = vld [vmem:[#allocation7 + $0x130] sm:$0xff] }
 0x137   :  { %v2794_v44 = vcombine.high %v214_v39, %v222_v40  ;;  %v207_v32 = vld [vmem:[#allocation7 + $0x170] sm:$0xff] }
 0x139   :  { %1100 = vmatpush1.bf16.msra.mxu1 %v2787_v47  ;;  %1141 = vmatpush1.bf16.msra.mxu0 %v2789_v48  ;;  %v230_v47 = vld [vmem:[#allocation7 + $0x228] sm:$0xff] }
 0x13a   :  { %1101 = vmatprep.subr.bf16.mxu1 %v2804_v49  ;;  %1142 = vmatprep.subr.bf16.mxu0 %v2806_v50  ;;  %v238_v48 = vld [vmem:[#allocation7 + $0x268] sm:$0xff]  ;;  %v2791_v49 = vcombine.low %v213_v37, %v221_v38  ;;  %v2793_v50 = vcombine.low %v214_v39, %v222_v40  ;;  %v2780_v37 = vcombine.high %v199_v31, %v207_v32  ;;  %v215_v39 = vld [vmem:[#allocation7 + $0x1b0] sm:$0xff] }
 0x13b   :  { %v2810_v52 = vcombine.high %v230_v47, %v238_v48  ;;  %v223_v40 = vld [vmem:[#allocation7 + $0x1f0] sm:$0xff] }
 0x13d   :  { %1102 = vmatpush1.bf16.msra.mxu1 %v2803_v55  ;;  %1143 = vmatpush1.bf16.msra.mxu0 %v2805_v56  ;;  %v246_v55 = vld [vmem:[#allocation7 + $0x2a8] sm:$0xff] }
 0x13e   :  { %1103 = vmatprep.subr.bf16.mxu1 %v2820_v57  ;;  %1144 = vmatprep.subr.bf16.mxu0 %v2822_v58  ;;  %v254_v56 = vld [vmem:[#allocation7 + $0x2e8] sm:$0xff]  ;;  %v2807_v57 = vcombine.low %v229_v45, %v237_v46  ;;  %v2809_v58 = vcombine.low %v230_v47, %v238_v48  ;;  %v2796_v45 = vcombine.high %v215_v39, %v223_v40  ;;  %v231_v47 = vld [vmem:[#allocation7 + $0x230] sm:$0xff] }
 0x13f   :  { %v2826_v60 = vcombine.high %v246_v55, %v254_v56  ;;  %v239_v48 = vld [vmem:[#allocation7 + $0x270] sm:$0xff] }
 0x141   :  { %1104 = vmatpush1.bf16.msra.mxu1 %v2819_v63  ;;  %1145 = vmatpush1.bf16.msra.mxu0 %v2821_v0  ;;  %v262_v63 = vld [vmem:[#allocation7 + $0x328] sm:$0xff] }
 0x142   :  { %1105 = vmatprep.subr.bf16.mxu1 %v2836_v1  ;;  %1146 = vmatprep.subr.bf16.mxu0 %v2838_v2  ;;  %v270_v0 = vld [vmem:[#allocation7 + $0x368] sm:$0xff]  ;;  %v2823_v1 = vcombine.low %v245_v53, %v253_v54  ;;  %v2825_v2 = vcombine.low %v246_v55, %v254_v56  ;;  %v2812_v53 = vcombine.high %v231_v47, %v239_v48  ;;  %v247_v54 = vld [vmem:[#allocation7 + $0x2b0] sm:$0xff]  ;;  %v248_v56 = vld [vmem:[#allocation7 + $0x2b8] sm:$0xff] }
 0x143   :  { %v2842_v4 = vcombine.high %v262_v63, %v270_v0  ;;  %v255_v55 = vld [vmem:[#allocation7 + $0x2f0] sm:$0xff] }
 0x145   :  { %1106 = vmatpush1.bf16.msra.mxu1 %v2835_v7  ;;  %1147 = vmatpush1.bf16.msra.mxu0 %v2837_v8  ;;  %v278_v7 = vld [vmem:[#allocation7 + $0x3a8] sm:$0xff] }
 0x146   :  { %1107 = vmatprep.subr.bf16.mxu1 %v2852_v9  ;;  %1148 = vmatprep.subr.bf16.mxu0 %v2854_v10  ;;  %v286_v8 = vld [vmem:[#allocation7 + $0x3e8] sm:$0xff]  ;;  %v2839_v9 = vcombine.low %v261_v61, %v269_v62  ;;  %v2841_v10 = vcombine.low %v262_v63, %v270_v0  ;;  %v263_v62 = vld [vmem:[#allocation7 + $0x330] sm:$0xff]  ;;  %v264_v0 = vld [vmem:[#allocation7 + $0x338] sm:$0xff] }
 0x147   :  { %v2858_v12 = vcombine.high %v278_v7, %v286_v8  ;;  %v271_v63 = vld [vmem:[#allocation7 + $0x370] sm:$0xff] }
 0x149   :  { %1108 = vmatpush1.bf16.msra.mxu1 %v2851_v16  ;;  %1149 = vmatpush1.bf16.msra.mxu0 %v2853_v17  ;;  %v168_v16 = vld [vmem:[#allocation7 + $0x38] sm:$0xff] }
 0x14a   :  { %1175 = vmatprep.subr.bf16.mxu1 %v2744_v18  ;;  %1216 = vmatprep.subr.bf16.mxu0 %v2746_v19  ;;  %v176_v17 = vld [vmem:[#allocation7 + $0x78] sm:$0xff]  ;;  %v2855_v18 = vcombine.low %v277_v5, %v285_v6  ;;  %v2857_v19 = vcombine.low %v278_v7, %v286_v8  ;;  %v279_v6 = vld [vmem:[#allocation7 + $0x3b0] sm:$0xff] }
 0x14b   :  { %v2750_v21 = vcombine.high %v168_v16, %v176_v17  ;;  %v287_v7 = vld [vmem:[#allocation7 + $0x3f0] sm:$0xff]  ;;  %v280_v8 = vld [vmem:[#allocation7 + $0x3b8] sm:$0xff] }
 0x14c   :  { %1126 = vmatmul.mubr.bf16.vlgmr.msra.gmra.mrb[4].mxu1 %v3531_v24  ;;  %1167 = vmatmul.mubr.bf16.vlgmr.msra.gmra.mrb[8].mxu0 %v3531_v24 }
 0x14d   :  { %1176 = vmatpush1.bf16.msra.mxu1 %v2743_v25  ;;  %1217 = vmatpush1.bf16.msra.mxu0 %v2745_v26  ;;  %v184_v25 = vld [vmem:[#allocation7 + $0xb8] sm:$0xff] }
 0x14e   :  { %1177 = vmatprep.subr.bf16.mxu1 %v2760_v27  ;;  %1218 = vmatprep.subr.bf16.mxu0 %v2762_v28  ;;  %v192_v26 = vld [vmem:[#allocation7 + $0xf8] sm:$0xff]  ;;  %v2747_v27 = vcombine.low %v167_v13, %v175_v15  ;;  %v2749_v28 = vcombine.low %v168_v16, %v176_v17  ;;  %v2859_v15 = vcombine.low %v279_v6, %v287_v7  ;;  %v3194_v17 = vld [vmem:[#allocation8 + $0x40] sm:$0xff]  }
 0x14f   :  { %1207 = vmatprep.mubr.bf16.mxu1 %v3454_v14  ;;  %1248 = vmatprep.mubr.bf16.mxu0 %v3454_v14  ;;  %v2766_v30 = vcombine.high %v184_v25, %v192_v26 }
 0x151   :  { %1178 = vmatpush1.bf16.msra.mxu1 %v2759_v33  ;;  %1219 = vmatpush1.bf16.msra.mxu0 %v2761_v34  ;;  %v200_v33 = vld [vmem:[#allocation7 + $0x138] sm:$0xff] }
 0x152   :  { %1179 = vmatprep.subr.bf16.mxu1 %v2776_v35  ;;  %1220 = vmatprep.subr.bf16.mxu0 %v2778_v36  ;;  %v208_v34 = vld [vmem:[#allocation7 + $0x178] sm:$0xff]  ;;  %v2763_v35 = vcombine.low %v183_v22, %v191_v23  ;;  %v2765_v36 = vcombine.low %v184_v25, %v192_v26  ;;  %v3199_v22 = vld [vmem:[#allocation8 + $0xc8] sm:$0xff]   ;;  %v3202_v26 = vld [vmem:[#allocation8 + $0x50] sm:$0xff]  }
 0x153   :  { %v2782_v38 = vcombine.high %v200_v33, %v208_v34  ;;  %v3200_v23 = vld [vmem:[#allocation8 + $0x8] sm:$0xff]  }
 0x154   :  { %v3201_v25 = vld [vmem:[#allocation8 + $0x88] sm:$0xff]  }
 0x155   :  { %1180 = vmatpush1.bf16.msra.mxu1 %v2775_v41  ;;  %1221 = vmatpush1.bf16.msra.mxu0 %v2777_v42  ;;  %v216_v41 = vld [vmem:[#allocation7 + $0x1b8] sm:$0xff] }
 0x156   :  { %1181 = vmatprep.subr.bf16.mxu1 %v2792_v43  ;;  %1222 = vmatprep.subr.bf16.mxu0 %v2794_v44  ;;  %v224_v42 = vld [vmem:[#allocation7 + $0x1f8] sm:$0xff]  ;;  %v2779_v43 = vcombine.low %v199_v31, %v207_v32  ;;  %v2781_v44 = vcombine.low %v200_v33, %v208_v34  ;;  %v3210_v33 = vld [vmem:[#allocation8 + $0x60] sm:$0xff]  }
 0x157   :  { %v2798_v46 = vcombine.high %v216_v41, %v224_v42  ;;  %v3207_v31 = vld [vmem:[#allocation8 + $0xd8] sm:$0xff]   ;;  %v3211_v34 = vld [vmem:[#allocation8 + $0xe0] sm:$0xff]  }
 0x158   :  { %v3208_v32 = vld [vmem:[#allocation8 + $0x18] sm:$0xff]  }
 0x159   :  { %1182 = vmatpush1.bf16.msra.mxu1 %v2791_v49  ;;  %1223 = vmatpush1.bf16.msra.mxu0 %v2793_v50  ;;  %v232_v49 = vld [vmem:[#allocation7 + $0x238] sm:$0xff] }
 0x15a   :  { %1183 = vmatprep.subr.bf16.mxu1 %v2808_v51  ;;  %1224 = vmatprep.subr.bf16.mxu0 %v2810_v52  ;;  %v240_v50 = vld [vmem:[#allocation7 + $0x278] sm:$0xff]  ;;  %v2795_v51 = vcombine.low %v215_v39, %v223_v40  ;;  %v2797_v52 = vcombine.low %v216_v41, %v224_v42  ;;  %v3216_v39 = vld [vmem:[#allocation8 + $0x28] sm:$0xff]   ;;  %v3218_v41 = vld [vmem:[#allocation8 + $0x70] sm:$0xff]  }
 0x15b   :  { %v3217_v40 = vld [vmem:[#allocation8 + $0xa8] sm:$0xff]   ;;  %v3219_v42 = vld [vmem:[#allocation8 + $0xf0] sm:$0xff]  }
 0x15d   :  { %1184 = vmatpush1.bf16.msra.mxu1 %v2807_v57  ;;  %1225 = vmatpush1.bf16.msra.mxu0 %v2809_v58  ;;  %v256_v57 = vld [vmem:[#allocation7 + $0x2f8] sm:$0xff]  ;;  %v2811_v58 = vcombine.low %v231_v47, %v239_v48 }
 0x15e   :  { %1185 = vmatprep.subr.bf16.mxu1 %v2824_v59  ;;  %1226 = vmatprep.subr.bf16.mxu0 %v2826_v60  ;;  %v2813_v59 = vcombine.low %v232_v49, %v240_v50  ;;  %v2828_v60 = vcombine.high %v247_v54, %v255_v55  ;;  %v2830_v61 = vcombine.high %v248_v56, %v256_v57  ;;  %v3224_v47 = vld [vmem:[#allocation8 + $0x38] sm:$0xff]  }
 0x15f   :  { %v3225_v48 = vld [vmem:[#allocation8 + $0xb8] sm:$0xff]  }
 0x161   :  { %1186 = vmatpush1.bf16.msra.mxu1 %v2823_v1  ;;  %1227 = vmatpush1.bf16.msra.mxu0 %v2825_v2  ;;  %v272_v1 = vld [vmem:[#allocation7 + $0x378] sm:$0xff]  ;;  %v2827_v2 = vcombine.low %v247_v54, %v255_v55 }
 0x162   :  { %1187 = vmatprep.subr.bf16.mxu1 %v2840_v3  ;;  %1228 = vmatprep.subr.bf16.mxu0 %v2842_v4  ;;  %v2829_v3 = vcombine.low %v248_v56, %v256_v57  ;;  %v2844_v4 = vcombine.high %v263_v62, %v271_v63  ;;  %v2846_v5 = vcombine.high %v264_v0, %v272_v1 }
 0x165   :  { %1188 = vmatpush1.bf16.msra.mxu1 %v2839_v9  ;;  %1229 = vmatpush1.bf16.msra.mxu0 %v2841_v10  ;;  %v288_v9 = vld [vmem:[#allocation7 + $0x3f8] sm:$0xff]  ;;  %v2843_v10 = vcombine.low %v263_v62, %v271_v63 }
 0x166   :  { %1189 = vmatprep.subr.bf16.mxu1 %v2856_v11  ;;  %1230 = vmatprep.subr.bf16.mxu0 %v2858_v12  ;;  %v2845_v11 = vcombine.low %v264_v0, %v272_v1  ;;  %v2860_v12 = vcombine.high %v279_v6, %v287_v7  ;;  %v2862_v13 = vcombine.high %v280_v8, %v288_v9 }
 0x167   :  { %v2861_v16 = vcombine.low %v280_v8, %v288_v9 }
 0x169   :  { %1190 = vmatpush1.bf16.msra.mxu1 %v2855_v18  ;;  %1231 = vmatpush1.bf16.msra.mxu0 %v2857_v19  ;;  %v3195_v18 = vld [vmem:[#allocation8 + $0xc0] sm:$0xff]  }
 0x16a   :  { %1257 = vmatprep.subr.bf16.mxu1 %v2748_v20  ;;  %1298 = vmatprep.subr.bf16.mxu0 %v2750_v21  ;;  %v3196_v19 = vld [vmem:[#allocation8] sm:$0xff]   ;;  %v3198_v21 = vld [vmem:[#allocation8 + $0x48] sm:$0xff]  }
 0x16b   :  { %v3197_v20 = vld [vmem:[#allocation8 + $0x80] sm:$0xff]  }
 0x16c   :  { %1208 = vmatmul.mubr.bf16.vlgmr.msra.gmra.mrb[8].mxu1 %v3531_v24  ;;  %1249 = vmatmul.mubr.bf16.vlgmr.msra.gmra.mrb[12].mxu0 %v3531_v24 }
 0x16d   :  { %1258 = vmatpush1.bf16.msra.mxu1 %v2747_v27  ;;  %1299 = vmatpush1.bf16.msra.mxu0 %v2749_v28  ;;  %v3203_v27 = vld [vmem:[#allocation8 + $0xd0] sm:$0xff]  }
 0x16e   :  { %1259 = vmatprep.subr.bf16.mxu1 %v2764_v29  ;;  %1300 = vmatprep.subr.bf16.mxu0 %v2766_v30  ;;  %v3204_v28 = vld [vmem:[#allocation8 + $0x10] sm:$0xff]   ;;  %v3206_v30 = vld [vmem:[#allocation8 + $0x58] sm:$0xff]  }
 0x16f   :  { %1289 = vmatprep.mubr.bf16.mxu1 %v3454_v14  ;;  %1330 = vmatprep.mubr.bf16.mxu0 %v3454_v14  ;;  %v2814_v14 = vcombine.high %v232_v49, %v240_v50  ;;  %v3205_v29 = vld [vmem:[#allocation8 + $0x90] sm:$0xff]   ;;  %v3226_v49 = vld [vmem:[#allocation8 + $0x140] sm:$0xff]  }
 0x170   :  { %v3227_v50 = vld [vmem:[#allocation8 + $0x1c0] sm:$0xff]  }
 0x171   :  { %1260 = vmatpush1.bf16.msra.mxu1 %v2763_v35  ;;  %1301 = vmatpush1.bf16.msra.mxu0 %v2765_v36  ;;  %v3212_v35 = vld [vmem:[#allocation8 + $0x20] sm:$0xff]  }
 0x172   :  { %1261 = vmatprep.subr.bf16.mxu1 %v2780_v37  ;;  %1302 = vmatprep.subr.bf16.mxu0 %v2782_v38  ;;  %v3213_v36 = vld [vmem:[#allocation8 + $0xa0] sm:$0xff]   ;;  %v3214_v37 = vld [vmem:[#allocation8 + $0x68] sm:$0xff]  }
 0x173   :  { %v3215_v38 = vld [vmem:[#allocation8 + $0xe8] sm:$0xff]  }
 0x175   :  { %1262 = vmatpush1.bf16.msra.mxu1 %v2779_v43  ;;  %1303 = vmatpush1.bf16.msra.mxu0 %v2781_v44  ;;  %v3220_v43 = vld [vmem:[#allocation8 + $0x30] sm:$0xff]  }
 0x176   :  { %1263 = vmatprep.subr.bf16.mxu1 %v2796_v45  ;;  %1304 = vmatprep.subr.bf16.mxu0 %v2798_v46  ;;  %v3221_v44 = vld [vmem:[#allocation8 + $0xb0] sm:$0xff]   ;;  %v3222_v45 = vld [vmem:[#allocation8 + $0x78] sm:$0xff]  }
 0x177   :  { %v3223_v46 = vld [vmem:[#allocation8 + $0xf8] sm:$0xff]  }
 0x179   :  { %1264 = vmatpush1.bf16.msra.mxu1 %v2795_v51  ;;  %1305 = vmatpush1.bf16.msra.mxu0 %v2797_v52  ;;  %v291_v51 = vlaneseq }
 0x17a   :  { %1265 = vmatprep.subr.bf16.mxu1 %v2812_v53  ;;  %1306 = vmatprep.subr.bf16.mxu0 %v2814_v14  ;;  %v77_v53 = vld [vmem:[#allocation5 + $0x102] ss:$8 sm:$0xf] }
 0x17b   :  { %v3547_v52 = vshrl.u32 %v291_v51, 7  ;;  %v78_v14 = vld [vmem:[#allocation5 + $0x102] ss:$8 sm:$0xf0] }
 0x17c   :  { %v3549_v54 = vor.u32 %v78_v14, %v77_v53  ;;  %v3252_v53 = vld [vmem:[#allocation8 + $0x130] sm:$0xff]  }
 0x17d   :  { %1266 = vmatpush1.bf16.msra.mxu1 %v2811_v58  ;;  %1307 = vmatpush1.bf16.msra.mxu0 %v2813_v59  ;;  %v293_v55 = vsub.s32 0, %v3547_v52  ;;  %v301_v56 = vsub.s32 2, %v3547_v52  ;;  %v297_v57 = vsub.s32 1, %v3547_v52  ;;  %v305_v58 = vsub.s32 3, %v3547_v52  ;;  %v3253_v14 = vld [vmem:[#allocation8 + $0x1b0] sm:$0xff]  }
 0x17e   :  { %1267 = vmatprep.subr.bf16.mxu1 %v2828_v60  ;;  %1308 = vmatprep.subr.bf16.mxu0 %v2830_v61 }
 0x17f   :  { %v294_v59 = vrot.slane %v3549_v54, %v293_v55  ;;  %v302_v60 = vrot.slane %v3549_v54, %v301_v56  ;;  %v298_v61 = vrot.slane %v3549_v54, %v297_v57  ;;  %v306_v62 = vrot.slane %v3549_v54, %v305_v58 }
 0x181   :  { %1268 = vmatpush1.bf16.msra.mxu1 %v2827_v2  ;;  %1309 = vmatpush1.bf16.msra.mxu0 %v2829_v3 }
 0x182   :  { %1269 = vmatprep.subr.bf16.mxu1 %v2844_v4  ;;  %1310 = vmatprep.subr.bf16.mxu0 %v2846_v5 }
 0x185   :  { %1270 = vmatpush1.bf16.msra.mxu1 %v2843_v10  ;;  %1311 = vmatpush1.bf16.msra.mxu0 %v2845_v11 }
 0x186   :  { %1271 = vmatprep.subr.bf16.mxu1 %v2860_v12  ;;  %1312 = vmatprep.subr.bf16.mxu0 %v2862_v13 }
 0x189   :  { %1272 = vmatpush1.bf16.msra.mxu1 %v2859_v15  ;;  %1313 = vmatpush1.bf16.msra.mxu0 %v2861_v16 }
 0x18a   :  { %2994 = vmatprep.subr.bf16.mxu1 %v3194_v17  ;;  %3016 = vmatprep.subr.bf16.mxu0 %v3195_v18  ;;  %v3228_v18 = vld [vmem:[#allocation8 + $0x100] sm:$0xff]  }
 0x18c   :  { %1290 = vmatmul.mubr.bf16.vlgmr.msra.gmra.mrb[12].mxu1 %v3531_v24  ;;  %1331 = vmatmul.mubr.bf16.vlgmr.msra.gmra.mrb[16].mxu0 %v3531_v24  ;;  %v3209_v24 = vld [vmem:[#allocation8 + $0x98] sm:$0xff]  }
 0x18d   :  { %2995 = vmatpush3.bf16.msra.mxu1 %v3196_v19  ;;  %3017 = vmatpush3.bf16.msra.mxu0 %v3197_v20  ;;  %v3229_v19 = vld [vmem:[#allocation8 + $0x180] sm:$0xff]  }
 0x18e   :  { %2996 = vmatprep.subr.bf16.mxu1 %v3198_v21  ;;  %3018 = vmatprep.subr.bf16.mxu0 %v3199_v22  ;;  %v3230_v22 = vld [vmem:[#allocation8 + $0x148] sm:$0xff]  }
 0x191   :  { %2997 = vmatpush3.bf16.msra.mxu1 %v3200_v23  ;;  %3019 = vmatpush3.bf16.msra.mxu0 %v3201_v25  ;;  %v3231_v23 = vld [vmem:[#allocation8 + $0x1c8] sm:$0xff]  }
 0x192   :  { %2998 = vmatprep.subr.bf16.mxu1 %v3202_v26  ;;  %3020 = vmatprep.subr.bf16.mxu0 %v3203_v27  ;;  %v3232_v25 = vld [vmem:[#allocation8 + $0x108] sm:$0xff]   ;;  %v3234_v27 = vld [vmem:[#allocation8 + $0x150] sm:$0xff]  }
 0x193   :  { %v3233_v26 = vld [vmem:[#allocation8 + $0x188] sm:$0xff]  }
 0x195   :  { %2999 = vmatpush3.bf16.msra.mxu1 %v3204_v28  ;;  %3021 = vmatpush3.bf16.msra.mxu0 %v3205_v29  ;;  %v3235_v28 = vld [vmem:[#allocation8 + $0x1d0] sm:$0xff]  }
 0x196   :  { %3000 = vmatprep.subr.bf16.mxu1 %v3206_v30  ;;  %3022 = vmatprep.subr.bf16.mxu0 %v3207_v31  ;;  %v3236_v29 = vld [vmem:[#allocation8 + $0x110] sm:$0xff]   ;;  %v3238_v31 = vld [vmem:[#allocation8 + $0x158] sm:$0xff]  }
 0x197   :  { %v3237_v30 = vld [vmem:[#allocation8 + $0x190] sm:$0xff]  }
 0x199   :  { %3001 = vmatpush3.bf16.msra.mxu1 %v3208_v32  ;;  %3023 = vmatpush3.bf16.msra.mxu0 %v3209_v24  ;;  %v3239_v32 = vld [vmem:[#allocation8 + $0x1d8] sm:$0xff]  }
 0x19a   :  { %3002 = vmatprep.subr.bf16.mxu1 %v3210_v33  ;;  %3024 = vmatprep.subr.bf16.mxu0 %v3211_v34  ;;  %v3240_v24 = vld [vmem:[#allocation8 + $0x118] sm:$0xff]   ;;  %v3242_v34 = vld [vmem:[#allocation8 + $0x160] sm:$0xff]  }
 0x19b   :  { %v3241_v33 = vld [vmem:[#allocation8 + $0x198] sm:$0xff]  }
 0x19d   :  { %3003 = vmatpush3.bf16.msra.mxu1 %v3212_v35  ;;  %3025 = vmatpush3.bf16.msra.mxu0 %v3213_v36  ;;  %v3243_v35 = vld [vmem:[#allocation8 + $0x1e0] sm:$0xff]  }
 0x19e   :  { %3004 = vmatprep.subr.bf16.mxu1 %v3214_v37  ;;  %3026 = vmatprep.subr.bf16.mxu0 %v3215_v38  ;;  %v3244_v36 = vld [vmem:[#allocation8 + $0x120] sm:$0xff]   ;;  %v3246_v38 = vld [vmem:[#allocation8 + $0x168] sm:$0xff]  }
 0x19f   :  { %v3245_v37 = vld [vmem:[#allocation8 + $0x1a0] sm:$0xff]  }
 0x1a1   :  { %3005 = vmatpush3.bf16.msra.mxu1 %v3216_v39  ;;  %3027 = vmatpush3.bf16.msra.mxu0 %v3217_v40  ;;  %v3247_v39 = vld [vmem:[#allocation8 + $0x1e8] sm:$0xff]   ;;  %v309_v40 = vsub.s32 4, %v3547_v52 }
 0x1a2   :  { %3006 = vmatprep.subr.bf16.mxu1 %v3218_v41  ;;  %3028 = vmatprep.subr.bf16.mxu0 %v3219_v42  ;;  %v317_v41 = vsub.s32 6, %v3547_v52  ;;  %v3248_v42 = vld [vmem:[#allocation8 + $0x128] sm:$0xff]  }
 0x1a5   :  { %3007 = vmatpush3.bf16.msra.mxu1 %v3220_v43  ;;  %3029 = vmatpush3.bf16.msra.mxu0 %v3221_v44  ;;  %v3249_v43 = vld [vmem:[#allocation8 + $0x1a8] sm:$0xff]   ;;  %v313_v44 = vsub.s32 5, %v3547_v52 }
 0x1a6   :  { %3008 = vmatprep.subr.bf16.mxu1 %v3222_v45  ;;  %3030 = vmatprep.subr.bf16.mxu0 %v3223_v46  ;;  %v321_v45 = vsub.s32 7, %v3547_v52  ;;  %v3250_v46 = vld [vmem:[#allocation8 + $0x170] sm:$0xff]   ;;  %v3320_v52 = vld [vmem:[#allocation8 + $0x338] sm:$0xff]  }
 0x1a8   :  { %v322_v51 = vrot.slane %v3549_v54, %v321_v45 }
 0x1a9   :  { %3009 = vmatpush3.bf16.msra.mxu1 %v3224_v47  ;;  %3031 = vmatpush3.bf16.msra.mxu0 %v3225_v48  ;;  %v3251_v47 = vld [vmem:[#allocation8 + $0x1f0] sm:$0xff]   ;;  %v310_v48 = vrot.slane %v3549_v54, %v309_v40 }
 0x1aa   :  { %3038 = vmatprep.subr.bf16.mxu1 %v3226_v49  ;;  %3060 = vmatprep.subr.bf16.mxu0 %v3227_v50  ;;  %v318_v49 = vrot.slane %v3549_v54, %v317_v41  ;;  %v314_v50 = vrot.slane %v3549_v54, %v313_v44  ;;  %v3257_v54 = vld [vmem:[#allocation8 + $0x1b8] sm:$0xff]  }
 0x1ff   :  { %v1045_v63 = vpop.f32.mrb[0].mxu1  ;;  %v1086_v0 = vpop.f32.mrb[4].mxu0 }
 0x200   :  { %v1046_v1 = vadd.f32 %v1045_v63, %v294_v59  ;;  %v1087_v2 = vadd.f32 %v1086_v0, %v302_v60  ;;  %v1047_v3 = vpop.f32.mrb[1].mxu1  ;;  %v1088_v4 = vpop.f32.mrb[5].mxu0  ;;  %v3254_v59 = vld [vmem:[#allocation8 + $0x178] sm:$0xff]  }
 0x201   :  { %v1048_v5 = vadd.f32 %v1047_v3, %v298_v61  ;;  %v1089_v6 = vadd.f32 %v1088_v4, %v306_v62  ;;  %v1049_v7 = vpop.f32.mrb[2].mxu1  ;;  %v1090_v8 = vpop.f32.mrb[6].mxu0  ;;  %v3255_v60 = vld [vmem:[#allocation8 + $0x1f8] sm:$0xff]  }
 0x202   :  { %v1339_v9 = vmax.f32 %v1046_v1, 0.0  ;;  %v1341_v10 = vmax.f32 %v1087_v2, 0.0  ;;  %v1050_v11 = vpop.f32.mrb[3].mxu1  ;;  %v1091_v12 = vpop.f32.mrb[7].mxu0  ;;  %v3256_v7 = vld [vmem:[#allocation8 + $0x138] sm:$0xff]  }
 0x203   :  { %v1340_v13 = vmax.f32 %v1048_v5, 0.0  ;;  %v1342_v15 = vmax.f32 %v1089_v6, 0.0  ;;  %v3258_v12 = vld [vmem:[#allocation8 + $0x240] sm:$0xff]  }
 0x204   :  { %v1355_v20 = vpack.c.bf16 %v1339_v9, %v1339_v9  ;;  %v1357_v21 = vpack.c.bf16 %v1341_v10, %v1341_v10 }
 0x205   :  { %v1356_v16 = vpack.c.bf16 %v1340_v13, %v1340_v13  ;;  %v1358_v17 = vpack.c.bf16 %v1342_v15, %v1342_v15  ;;  %v3259_v13 = vld [vmem:[#allocation8 + $0x2c0] sm:$0xff]  }
 0x207   :  { %2427 = vmatprep.mubr.bf16.mxu1 %v1356_v16  ;;  %2467 = vmatprep.mubr.bf16.mxu0 %v1358_v17 }
 0x208   :  { %2428 = vmatmul.mubr.bf16.vlgmr.msra.gmra.mrb[16].mxu1 %v1355_v20  ;;  %2468 = vmatmul.mubr.bf16.vlgmr.msra.gmra.mrb[20].mxu0 %v1357_v21  ;;  %v3261_v20 = vld [vmem:[#allocation8 + $0x280] sm:$0xff]  }
 0x209   :  { %3039 = vmatpush3.bf16.msra.mxu1 %v3228_v18  ;;  %3061 = vmatpush3.bf16.msra.mxu0 %v3229_v19  ;;  %v3260_v19 = vld [vmem:[#allocation8 + $0x200] sm:$0xff]  }
 0x20a   :  { %3040 = vmatprep.subr.bf16.mxu1 %v3230_v22  ;;  %3062 = vmatprep.subr.bf16.mxu0 %v3231_v23  ;;  %v3262_v23 = vld [vmem:[#allocation8 + $0x248] sm:$0xff]  }
 0x20d   :  { %3041 = vmatpush3.bf16.msra.mxu1 %v3232_v25  ;;  %3063 = vmatpush3.bf16.msra.mxu0 %v3233_v26  ;;  %v3263_v25 = vld [vmem:[#allocation8 + $0x2c8] sm:$0xff]  }
 0x20e   :  { %3042 = vmatprep.subr.bf16.mxu1 %v3234_v27  ;;  %3064 = vmatprep.subr.bf16.mxu0 %v3235_v28  ;;  %v3264_v26 = vld [vmem:[#allocation8 + $0x208] sm:$0xff]   ;;  %v3266_v28 = vld [vmem:[#allocation8 + $0x250] sm:$0xff]  }
 0x20f   :  { %v3265_v27 = vld [vmem:[#allocation8 + $0x288] sm:$0xff]  }
 0x211   :  { %3043 = vmatpush3.bf16.msra.mxu1 %v3236_v29  ;;  %3065 = vmatpush3.bf16.msra.mxu0 %v3237_v30  ;;  %v3267_v29 = vld [vmem:[#allocation8 + $0x2d0] sm:$0xff]  }
 0x212   :  { %3044 = vmatprep.subr.bf16.mxu1 %v3238_v31  ;;  %3066 = vmatprep.subr.bf16.mxu0 %v3239_v32  ;;  %v3268_v30 = vld [vmem:[#allocation8 + $0x210] sm:$0xff]   ;;  %v3270_v32 = vld [vmem:[#allocation8 + $0x258] sm:$0xff]  }
 0x213   :  { %v3269_v31 = vld [vmem:[#allocation8 + $0x290] sm:$0xff]  }
 0x215   :  { %3045 = vmatpush3.bf16.msra.mxu1 %v3240_v24  ;;  %3067 = vmatpush3.bf16.msra.mxu0 %v3241_v33  ;;  %v3271_v24 = vld [vmem:[#allocation8 + $0x2d8] sm:$0xff]  }
 0x216   :  { %3046 = vmatprep.subr.bf16.mxu1 %v3242_v34  ;;  %3068 = vmatprep.subr.bf16.mxu0 %v3243_v35  ;;  %v3272_v33 = vld [vmem:[#allocation8 + $0x218] sm:$0xff]   ;;  %v3274_v35 = vld [vmem:[#allocation8 + $0x260] sm:$0xff]  }
 0x217   :  { %v3273_v34 = vld [vmem:[#allocation8 + $0x298] sm:$0xff]  }
 0x219   :  { %3047 = vmatpush3.bf16.msra.mxu1 %v3244_v36  ;;  %3069 = vmatpush3.bf16.msra.mxu0 %v3245_v37  ;;  %v3275_v36 = vld [vmem:[#allocation8 + $0x2e0] sm:$0xff]  }
 0x21a   :  { %3048 = vmatprep.subr.bf16.mxu1 %v3246_v38  ;;  %3070 = vmatprep.subr.bf16.mxu0 %v3247_v39  ;;  %v3276_v37 = vld [vmem:[#allocation8 + $0x220] sm:$0xff]  }
 0x21b   :  { %v3277_v38 = vld [vmem:[#allocation8 + $0x2a0] sm:$0xff]  }
 0x21c   :  { %v81_v39 = vld [vmem:[#allocation5 + $0x142] ss:$8 sm:$0xf] }
 0x21d   :  { %3049 = vmatpush3.bf16.msra.mxu1 %v3248_v42  ;;  %3071 = vmatpush3.bf16.msra.mxu0 %v3249_v43  ;;  %v82_v42 = vld [vmem:[#allocation5 + $0x142] ss:$8 sm:$0xf0] }
 0x21e   :  { %3050 = vmatprep.subr.bf16.mxu1 %v3250_v46  ;;  %3072 = vmatprep.subr.bf16.mxu0 %v3251_v47  ;;  %v3278_v43 = vld [vmem:[#allocation8 + $0x268] sm:$0xff]   ;;  %v3583_v47 = vor.u32 %v82_v42, %v81_v39 }
 0x21f   :  { %v1127_v61 = vpop.f32.mrb[4].mxu1  ;;  %v1168_v62 = vpop.f32.mrb[8].mxu0  ;;  %v3279_v46 = vld [vmem:[#allocation8 + $0x2e8] sm:$0xff]  }
 0x220   :  { %v1128_v63 = vadd.f32 %v1127_v61, %v310_v48  ;;  %v1169_v0 = vadd.f32 %v1168_v62, %v318_v49  ;;  %v1129_v1 = vpop.f32.mrb[5].mxu1  ;;  %v1170_v2 = vpop.f32.mrb[9].mxu0  ;;  %v3280_v48 = vld [vmem:[#allocation8 + $0x228] sm:$0xff]   ;;  %v3284_v61 = vld [vmem:[#allocation8 + $0x230] sm:$0xff]  }
 0x221   :  { %v1130_v3 = vadd.f32 %v1129_v1, %v314_v50  ;;  %v1171_v4 = vadd.f32 %v1170_v2, %v322_v51  ;;  %v1131_v5 = vpop.f32.mrb[6].mxu1  ;;  %v1172_v6 = vpop.f32.mrb[10].mxu0  ;;  %3051 = vmatpush3.bf16.msra.mxu1 %v3252_v53  ;;  %3073 = vmatpush3.bf16.msra.mxu0 %v3253_v14  ;;  %v3281_v49 = vld [vmem:[#allocation8 + $0x2a8] sm:$0xff]   ;;  %v3282_v50 = vld [vmem:[#allocation8 + $0x270] sm:$0xff]   ;;  %v326_v53 = vrot.slane %v3583_v47, %v293_v55  ;;  %v3287_v55 = vld [vmem:[#allocation8 + $0x2f8] sm:$0xff]  }
 0x222   :  { %v1343_v8 = vmax.f32 %v1128_v63, 0.0  ;;  %v1345_v9 = vmax.f32 %v1169_v0, 0.0  ;;  %v1132_v10 = vpop.f32.mrb[7].mxu1  ;;  %v1173_v11 = vpop.f32.mrb[11].mxu0  ;;  %3052 = vmatprep.subr.bf16.mxu1 %v3254_v59  ;;  %3074 = vmatprep.subr.bf16.mxu0 %v3255_v60  ;;  %v3283_v51 = vld [vmem:[#allocation8 + $0x2f0] sm:$0xff]   ;;  %v334_v14 = vrot.slane %v3583_v47, %v301_v56  ;;  %v330_v59 = vrot.slane %v3583_v47, %v297_v57  ;;  %v3286_v63 = vld [vmem:[#allocation8 + $0x278] sm:$0xff]  }
 0x223   :  { %v1344_v15 = vmax.f32 %v1130_v3, 0.0  ;;  %v1346_v16 = vmax.f32 %v1171_v4, 0.0  ;;  %v338_v60 = vrot.slane %v3583_v47, %v305_v58  ;;  %v3285_v62 = vld [vmem:[#allocation8 + $0x2b0] sm:$0xff]   ;;  %v3289_v58 = vld [vmem:[#allocation8 + $0x2b8] sm:$0xff]   ;;  %v3310_v39 = vld [vmem:[#allocation8 + $0x368] sm:$0xff]  }
 0x224   :  { %v1359_v21 = vpack.c.bf16 %v1343_v8, %v1343_v8  ;;  %v1361_v22 = vpack.c.bf16 %v1345_v9, %v1345_v9  ;;  %v3311_v42 = vld [vmem:[#allocation8 + $0x3e8] sm:$0xff]  }
 0x225   :  { %v1360_v17 = vpack.c.bf16 %v1344_v15, %v1344_v15  ;;  %v1362_v18 = vpack.c.bf16 %v1346_v16, %v1346_v16  ;;  %3053 = vmatpush3.bf16.msra.mxu1 %v3256_v7  ;;  %3075 = vmatpush3.bf16.msra.mxu0 %v3257_v54  ;;  %v3288_v54 = vld [vmem:[#allocation8 + $0x238] sm:$0xff]  }
 0x226   :  { %3082 = vmatprep.subr.bf16.mxu1 %v3258_v12  ;;  %3104 = vmatprep.subr.bf16.mxu0 %v3259_v13  ;;  %v3290_v12 = vld [vmem:[#allocation8 + $0x340] sm:$0xff]  }
 0x227   :  { %2507 = vmatprep.mubr.bf16.mxu1 %v1360_v17  ;;  %2547 = vmatprep.mubr.bf16.mxu0 %v1362_v18  ;;  %v3291_v13 = vld [vmem:[#allocation8 + $0x3c0] sm:$0xff]  }
 0x228   :  { %2508 = vmatmul.mubr.bf16.vlgmr.msra.gmra.mrb[20].mxu1 %v1359_v21  ;;  %2548 = vmatmul.mubr.bf16.vlgmr.msra.gmra.mrb[24].mxu0 %v1361_v22 }
 0x229   :  { %3083 = vmatpush3.bf16.msra.mxu1 %v3260_v19  ;;  %3105 = vmatpush3.bf16.msra.mxu0 %v3261_v20  ;;  %v3292_v19 = vld [vmem:[#allocation8 + $0x300] sm:$0xff]  }
 0x22a   :  { %3084 = vmatprep.subr.bf16.mxu1 %v3262_v23  ;;  %3106 = vmatprep.subr.bf16.mxu0 %v3263_v25  ;;  %v3293_v20 = vld [vmem:[#allocation8 + $0x380] sm:$0xff]   ;;  %v3294_v23 = vld [vmem:[#allocation8 + $0x348] sm:$0xff]  }
 0x22b   :  { %v3295_v25 = vld [vmem:[#allocation8 + $0x3c8] sm:$0xff]  }
 0x22d   :  { %3085 = vmatpush3.bf16.msra.mxu1 %v3264_v26  ;;  %3107 = vmatpush3.bf16.msra.mxu0 %v3265_v27  ;;  %v3296_v26 = vld [vmem:[#allocation8 + $0x308] sm:$0xff]  }
 0x22e   :  { %3086 = vmatprep.subr.bf16.mxu1 %v3266_v28  ;;  %3108 = vmatprep.subr.bf16.mxu0 %v3267_v29  ;;  %v3297_v27 = vld [vmem:[#allocation8 + $0x388] sm:$0xff]   ;;  %v3298_v28 = vld [vmem:[#allocation8 + $0x350] sm:$0xff]  }
 0x22f   :  { %v3299_v29 = vld [vmem:[#allocation8 + $0x3d0] sm:$0xff]  }
 0x231   :  { %3087 = vmatpush3.bf16.msra.mxu1 %v3268_v30  ;;  %3109 = vmatpush3.bf16.msra.mxu0 %v3269_v31  ;;  %v3300_v30 = vld [vmem:[#allocation8 + $0x310] sm:$0xff]  }
 0x232   :  { %3088 = vmatprep.subr.bf16.mxu1 %v3270_v32  ;;  %3110 = vmatprep.subr.bf16.mxu0 %v3271_v24  ;;  %v3301_v31 = vld [vmem:[#allocation8 + $0x390] sm:$0xff]   ;;  %v3302_v32 = vld [vmem:[#allocation8 + $0x358] sm:$0xff]  }
 0x233   :  { %v3303_v24 = vld [vmem:[#allocation8 + $0x3d8] sm:$0xff]  }
 0x235   :  { %3089 = vmatpush3.bf16.msra.mxu1 %v3272_v33  ;;  %3111 = vmatpush3.bf16.msra.mxu0 %v3273_v34  ;;  %v3304_v33 = vld [vmem:[#allocation8 + $0x318] sm:$0xff]  }
 0x236   :  { %3090 = vmatprep.subr.bf16.mxu1 %v3274_v35  ;;  %3112 = vmatprep.subr.bf16.mxu0 %v3275_v36  ;;  %v3305_v34 = vld [vmem:[#allocation8 + $0x398] sm:$0xff]   ;;  %v3306_v35 = vld [vmem:[#allocation8 + $0x360] sm:$0xff]  }
 0x237   :  { %v3307_v36 = vld [vmem:[#allocation8 + $0x3e0] sm:$0xff]  }
 0x239   :  { %3091 = vmatpush3.bf16.msra.mxu1 %v3276_v37  ;;  %3113 = vmatpush3.bf16.msra.mxu0 %v3277_v38  ;;  %v3308_v37 = vld [vmem:[#allocation8 + $0x320] sm:$0xff]  }
 0x23a   :  { %3092 = vmatprep.subr.bf16.mxu1 %v3278_v43  ;;  %3114 = vmatprep.subr.bf16.mxu0 %v3279_v46  ;;  %v3309_v38 = vld [vmem:[#allocation8 + $0x3a0] sm:$0xff]   ;;  %v3312_v43 = vld [vmem:[#allocation8 + $0x328] sm:$0xff]  }
 0x23b   :  { %v3313_v46 = vld [vmem:[#allocation8 + $0x3a8] sm:$0xff]  }
 0x23d   :  { %3093 = vmatpush3.bf16.msra.mxu1 %v3280_v48  ;;  %3115 = vmatpush3.bf16.msra.mxu0 %v3281_v49  ;;  %v3314_v48 = vld [vmem:[#allocation8 + $0x370] sm:$0xff]  }
 0x23e   :  { %3094 = vmatprep.subr.bf16.mxu1 %v3282_v50  ;;  %3116 = vmatprep.subr.bf16.mxu0 %v3283_v51  ;;  %v3315_v49 = vld [vmem:[#allocation8 + $0x3f0] sm:$0xff]   ;;  %v342_v50 = vrot.slane %v3583_v47, %v309_v40  ;;  %v350_v51 = vrot.slane %v3583_v47, %v317_v41  ;;  %v3319_v40 = vld [vmem:[#allocation8 + $0x3f8] sm:$0xff]  }
 0x23f   :  { %v1209_v0 = vpop.f32.mrb[8].mxu1  ;;  %v1250_v1 = vpop.f32.mrb[12].mxu0 }
 0x240   :  { %v1210_v2 = vadd.f32 %v1209_v0, %v326_v53  ;;  %v1251_v56 = vadd.f32 %v1250_v1, %v334_v14  ;;  %v1211_v3 = vpop.f32.mrb[9].mxu1  ;;  %v1252_v4 = vpop.f32.mrb[13].mxu0  ;;  %v346_v53 = vrot.slane %v3583_v47, %v313_v44  ;;  %v354_v14 = vrot.slane %v3583_v47, %v321_v45  ;;  %v3321_v45 = vld [vmem:[#allocation8 + $0x3b8] sm:$0xff]  }
 0x241   :  { %v1212_v5 = vadd.f32 %v1211_v3, %v330_v59  ;;  %v1253_v6 = vadd.f32 %v1252_v4, %v338_v60  ;;  %v1213_v7 = vpop.f32.mrb[10].mxu1  ;;  %v1254_v57 = vpop.f32.mrb[14].mxu0  ;;  %3095 = vmatpush3.bf16.msra.mxu1 %v3284_v61  ;;  %3117 = vmatpush3.bf16.msra.mxu0 %v3285_v62  ;;  %v3316_v59 = vld [vmem:[#allocation8 + $0x330] sm:$0xff]   ;;  %v3318_v61 = vld [vmem:[#allocation8 + $0x378] sm:$0xff]  }
 0x242   :  { %v1347_v8 = vmax.f32 %v1210_v2, 0.0  ;;  %v1349_v9 = vmax.f32 %v1251_v56, 0.0  ;;  %v1214_v10 = vpop.f32.mrb[11].mxu1  ;;  %v1255_v11 = vpop.f32.mrb[15].mxu0  ;;  %3096 = vmatprep.subr.bf16.mxu1 %v3286_v63  ;;  %3118 = vmatprep.subr.bf16.mxu0 %v3287_v55  ;;  %v3317_v60 = vld [vmem:[#allocation8 + $0x3b0] sm:$0xff]  }
 0x243   :  { %v1348_v15 = vmax.f32 %v1212_v5, 0.0  ;;  %v1350_v16 = vmax.f32 %v1253_v6, 0.0 }
 0x244   :  { %v1363_v21 = vpack.c.bf16 %v1347_v8, %v1347_v8  ;;  %v1365_v22 = vpack.c.bf16 %v1349_v9, %v1349_v9 }
 0x245   :  { %v1364_v17 = vpack.c.bf16 %v1348_v15, %v1348_v15  ;;  %v1366_v18 = vpack.c.bf16 %v1350_v16, %v1350_v16  ;;  %3097 = vmatpush3.bf16.msra.mxu1 %v3288_v54  ;;  %3119 = vmatpush3.bf16.msra.mxu0 %v3289_v58 }
 0x246   :  { %3126 = vmatprep.subr.bf16.mxu1 %v3290_v12  ;;  %3148 = vmatprep.subr.bf16.mxu0 %v3291_v13  ;;  %v75_v12 = vld [vmem:[#allocation5 + $0x101] ss:$0 sm:$0xff] }
 0x247   :  { %2587 = vmatprep.mubr.bf16.mxu1 %v1364_v17  ;;  %2627 = vmatprep.mubr.bf16.mxu0 %v1366_v18 }
 0x248   :  { %2588 = vmatmul.mubr.bf16.vlgmr.msra.gmra.mrb[24].mxu1 %v1363_v21  ;;  %2628 = vmatmul.mubr.bf16.vlgmr.msra.gmra.mrb[28].mxu0 %v1365_v22 }
 0x249   :  { %3127 = vmatpush3.bf16.msra.mxu1 %v3292_v19  ;;  %3149 = vmatpush3.bf16.msra.mxu0 %v3293_v20 }
 0x24a   :  { %3128 = vmatprep.subr.bf16.mxu1 %v3294_v23  ;;  %3150 = vmatprep.subr.bf16.mxu0 %v3295_v25 }
 0x24d   :  { %3129 = vmatpush3.bf16.msra.mxu1 %v3296_v26  ;;  %3151 = vmatpush3.bf16.msra.mxu0 %v3297_v27 }
 0x24e   :  { %3130 = vmatprep.subr.bf16.mxu1 %v3298_v28  ;;  %3152 = vmatprep.subr.bf16.mxu0 %v3299_v29 }
 0x251   :  { %3131 = vmatpush3.bf16.msra.mxu1 %v3300_v30  ;;  %3153 = vmatpush3.bf16.msra.mxu0 %v3301_v31 }
 0x252   :  { %3132 = vmatprep.subr.bf16.mxu1 %v3302_v32  ;;  %3154 = vmatprep.subr.bf16.mxu0 %v3303_v24 }
 0x255   :  { %3133 = vmatpush3.bf16.msra.mxu1 %v3304_v33  ;;  %3155 = vmatpush3.bf16.msra.mxu0 %v3305_v34 }
 0x256   :  { %3134 = vmatprep.subr.bf16.mxu1 %v3306_v35  ;;  %3156 = vmatprep.subr.bf16.mxu0 %v3307_v36 }
 0x259   :  { %3135 = vmatpush3.bf16.msra.mxu1 %v3308_v37  ;;  %3157 = vmatpush3.bf16.msra.mxu0 %v3309_v38 }
 0x25a   :  { %3136 = vmatprep.subr.bf16.mxu1 %v3310_v39  ;;  %3158 = vmatprep.subr.bf16.mxu0 %v3311_v42 }
 0x25d   :  { %3137 = vmatpush3.bf16.msra.mxu1 %v3312_v43  ;;  %3159 = vmatpush3.bf16.msra.mxu0 %v3313_v46 }
 0x25e   :  { %3138 = vmatprep.subr.bf16.mxu1 %v3314_v48  ;;  %3160 = vmatprep.subr.bf16.mxu0 %v3315_v49 }
 0x25f   :  { %v1291_v62 = vpop.f32.mrb[12].mxu1  ;;  %v1332_v63 = vpop.f32.mrb[16].mxu0 }
 0x260   :  { %v1292_v55 = vadd.f32 %v1291_v62, %v342_v50  ;;  %v1333_v41 = vadd.f32 %v1332_v63, %v350_v51  ;;  %v1293_v0 = vpop.f32.mrb[13].mxu1  ;;  %v1334_v1 = vpop.f32.mrb[17].mxu0 }
 0x261   :  { %v1294_v2 = vadd.f32 %v1293_v0, %v346_v53  ;;  %v1335_v56 = vadd.f32 %v1334_v1, %v354_v14  ;;  %v1295_v3 = vpop.f32.mrb[14].mxu1  ;;  %v1336_v44 = vpop.f32.mrb[18].mxu0  ;;  %3139 = vmatpush3.bf16.msra.mxu1 %v3316_v59  ;;  %3161 = vmatpush3.bf16.msra.mxu0 %v3317_v60 }
 0x262   :  { %v1351_v47 = vmax.f32 %v1292_v55, 0.0  ;;  %v1353_v4 = vmax.f32 %v1333_v41, 0.0  ;;  %v1296_v5 = vpop.f32.mrb[15].mxu1  ;;  %v1337_v6 = vpop.f32.mrb[19].mxu0  ;;  %3140 = vmatprep.subr.bf16.mxu1 %v3318_v61  ;;  %3162 = vmatprep.subr.bf16.mxu0 %v3319_v40 }
 0x263   :  { %v1352_v7 = vmax.f32 %v1294_v2, 0.0  ;;  %v1354_v57 = vmax.f32 %v1335_v56, 0.0 }
 0x264   :  { %v1367_v8 = vpack.c.bf16 %v1351_v47, %v1351_v47  ;;  %v1369_v9 = vpack.c.bf16 %v1353_v4, %v1353_v4 }
 0x265   :  { %v1368_v54 = vpack.c.bf16 %v1352_v7, %v1352_v7  ;;  %v1370_v58 = vpack.c.bf16 %v1354_v57, %v1354_v57  ;;  %3141 = vmatpush3.bf16.msra.mxu1 %v3320_v52  ;;  %3163 = vmatpush3.bf16.msra.mxu0 %v3321_v45 }
 0x267   :  { %2667 = vmatprep.mubr.bf16.mxu1 %v1368_v54  ;;  %2707 = vmatprep.mubr.bf16.mxu0 %v1370_v58 }
 0x268   :  { %2668 = vmatmul.mubr.bf16.vlgmr.msra.gmra.mrb[28].mxu1 %v1367_v8  ;;  %2708 = vmatmul.mubr.bf16.vlgmr.msra.gmra.mrb[32].mxu0 %v1369_v9 }
 0x2db   :  { %v3010_v10 = vpop.f32.mrb[16].mxu1  ;;  %v3032_v11 = vpop.f32.mrb[20].mxu0 }
 0x2dc   :  { %v3011_v13 = vpop.f32.mrb[17].mxu1  ;;  %v3033_v15 = vpop.f32.mrb[21].mxu0 }
 0x2dd   :  { %v3012_v16 = vadd.f32 %v3011_v13, %v3010_v10  ;;  %v3034_v17 = vadd.f32 %v3033_v15, %v3032_v11  ;;  %v3013_v18 = vpop.f32.mrb[18].mxu1  ;;  %v3035_v19 = vpop.f32.mrb[22].mxu0 }
 0x2de   :  { %v3014_v20 = vpop.f32.mrb[19].mxu1  ;;  %v3036_v21 = vpop.f32.mrb[23].mxu0 }
 0x2df   :  { %v2430_v22 = vadd.f32 %v3012_v16, %v75_v12 }
 0x2e1   :  { %v2470_v23 = vadd.f32 %v3034_v17, %v2430_v22 }
 0x2fb   :  { %v3054_v25 = vpop.f32.mrb[20].mxu1  ;;  %v3076_v26 = vpop.f32.mrb[24].mxu0 }
 0x2fc   :  { %v3055_v27 = vpop.f32.mrb[21].mxu1  ;;  %v3077_v28 = vpop.f32.mrb[25].mxu0 }
 0x2fd   :  { %v3056_v29 = vadd.f32 %v3055_v27, %v3054_v25  ;;  %v3078_v30 = vadd.f32 %v3077_v28, %v3076_v26  ;;  %v3057_v31 = vpop.f32.mrb[22].mxu1  ;;  %v3079_v32 = vpop.f32.mrb[26].mxu0 }
 0x2fe   :  { %v3058_v24 = vpop.f32.mrb[23].mxu1  ;;  %v3080_v33 = vpop.f32.mrb[27].mxu0 }
 0x2ff   :  { %v2510_v34 = vadd.f32 %v3056_v29, %v2470_v23 }
 0x301   :  { %v2550_v35 = vadd.f32 %v3078_v30, %v2510_v34 }
 0x31b   :  { %v3098_v36 = vpop.f32.mrb[24].mxu1  ;;  %v3120_v37 = vpop.f32.mrb[28].mxu0 }
 0x31c   :  { %v3099_v38 = vpop.f32.mrb[25].mxu1  ;;  %v3121_v39 = vpop.f32.mrb[29].mxu0 }
 0x31d   :  { %v3100_v42 = vadd.f32 %v3099_v38, %v3098_v36  ;;  %v3122_v43 = vadd.f32 %v3121_v39, %v3120_v37  ;;  %v3101_v46 = vpop.f32.mrb[26].mxu1  ;;  %v3123_v48 = vpop.f32.mrb[30].mxu0 }
 0x31e   :  { %v3102_v49 = vpop.f32.mrb[27].mxu1  ;;  %v3124_v50 = vpop.f32.mrb[31].mxu0 }
 0x31f   :  { %v2590_v51 = vadd.f32 %v3100_v42, %v2550_v35 }
 0x321   :  { %v2630_v53 = vadd.f32 %v3122_v43, %v2590_v51 }
 0x33b   :  { %v3142_v14 = vpop.f32.mrb[28].mxu1  ;;  %v3164_v59 = vpop.f32.mrb[32].mxu0 }
 0x33c   :  { %v3143_v60 = vpop.f32.mrb[29].mxu1  ;;  %v3165_v61 = vpop.f32.mrb[33].mxu0 }
 0x33d   :  { %v3144_v40 = vadd.f32 %v3143_v60, %v3142_v14  ;;  %v3166_v62 = vadd.f32 %v3165_v61, %v3164_v59  ;;  %v3145_v63 = vpop.f32.mrb[30].mxu1  ;;  %v3167_v55 = vpop.f32.mrb[34].mxu0 }
 0x33e   :  { %v3146_v41 = vpop.f32.mrb[31].mxu1  ;;  %v3168_v0 = vpop.f32.mrb[35].mxu0 }
 0x33f   :  { %v2670_v1 = vadd.f32 %v3144_v40, %v2630_v53 }
 0x341   :  { %v2710_v2 = vadd.f32 %v3166_v62, %v2670_v1 }
 0x343   :  { %3322 = vtanh.f32 %v2710_v2 }
 0x34d   :  { %v3323_v56 = vpop.eup %3322 }
 0x34e   :  { %2716 = vst [vmem:[#allocation10] sm:$0xff] %v3323_v56 }
 0x34f   :  { %3423 = shalt.err (!%p3420_p8)
}
 0x350   :  { %s3424_s16 = scalar_lea.hbm %s3625_s4, 128 }
 0x351   :  { %p3425_p9 = scmp.ne.s32.totalorder %s3625_s4, %s3424_s16  ;;  %p3428_p10 = scmp.lt.u32.totalorder %s3424_s16, %s3625_s4 }
 0x353   :  { %p3430_p11 = pnand %p3428_p10, %p3425_p9 }
 0x355   :  { %3433 = shalt.err (!%p3430_p11)
}
 0x356   :  { %2726 = dma.vmem_to_hbm [thread:$0]  %s2724_s13, 128, %s3625_s4, [#allocation4]  }
 0x357   :  { %3440 = dma.done.wait [#allocation4], 128  }
 0x358   :  { %3441 = vsyncadd [#allocation4], 4294967168 }
 0x359   :  { %2730 = vsyncpa [#allocation3], 1 }
 0x35a   :  { %2731 = vsyncpa [#allocation6], 1 }
 0x35b   :  { %2732 = vsyncpa [#allocation9], 1 }
 0x35c   :  { %2733 = vsyncpa [#allocation4], 1 }

</bundles_post_ra>
